<compile_context>
chip_gen: v7x
topology: tpu7x:2x2x1
jax: 0.10.0
libtpu: 0.0.40
codegen_flags: <defaults>
</compile_context>

<pallas_src>
import functools
import math

import jax
import jax.numpy as jnp
from jax.experimental import pallas as pl
from jax.experimental.pallas import tpu as pltpu


def _graph_conv_attn_kernel(adj_ref, node_ref, edge_ref, wbig_ref, we3_ref,
                            out_ref, *, dilation, nout, edge_nin):
    # ---- adjacency mask (adj == dilation); transpose in-kernel (XLU) -----
    adj_f = (adj_ref[0] == dilation).astype(jnp.float32)     # (W, W)
    adj_t_f = adj_f.T                                        # (W, W)

    # ---- one fused MXU push: [Wn; We1@Wn; We2@Wn] @ node ------------------
    node = node_ref[0]                                       # (Cn, W)
    big = jnp.dot(wbig_ref[...], node,
                  preferred_element_type=jnp.float32)        # (3*Co, W)
    y = big[:nout]                                           # Wn @ node
    u1 = big[nout:2 * nout]                                  # We1 @ y
    u2 = big[2 * nout:]                                      # We2 @ y

    # ---- edge contribution: z[o,i,j] = sum_c We3[o,c] * edge[c,i,j] -------
    w3 = we3_ref[...]                                        # (Co, Ce)
    edge = edge_ref[0]                                       # (Ce, W, W)
    z = w3[:, 0:1, None] * edge[0]                           # (Co, W, W)
    for c in range(1, edge_nin):                             # static unroll
        z = z + w3[:, c:c + 1, None] * edge[c]

    # ---- add node-pair terms (EdgeConvAttn pre-activation) ----------------
    z = (z
         + adj_f[None, :, :] * u1[:, None, :]                # node_mat path
         + adj_t_f[None, :, :] * u2[:, :, None])             # node_mat^T path

    # ---- LeakyReLU(0.2), masked softmax over j, re-mask -------------------
    p = jnp.where(z >= 0, z, 0.2 * z)
    masked = jnp.where(adj_f[None, :, :] > 0, p, -9e15)
    m = jnp.max(masked, axis=-1, keepdims=True)
    e = jnp.exp(masked - m)
    s = jnp.sum(e, axis=-1, keepdims=True)
    attn = e * pl.reciprocal(s, approx=True) * adj_f[None, :, :]  # (Co, W, W)

    # ---- node_mat-free epilogue: out[c,i] = sum_j attn[c,i,j] * y[c,j] ----
    # Valid because adj_f is strictly 0/1 and attn already carries adj_f.
    out_ref[0] = jnp.sum(attn * y[:, None, :], axis=-1)      # (Co, W)


def graph_conv_attn(adj, node, edge, wn, we, *, dilation=1):
    """Pallas implementation of GraphConvAttn.forward.

    adj  : (B, W, W) float32 (integer dilation labels)
    node : (B, Cn, W) float32
    edge : (B, Ce, W, W) float32
    wn   : (Co, Cn) float32          -- NodeConvAttn 1x1 conv weight
    we   : (Co, 2*Co + Ce) float32   -- EdgeConvAttn 1x1 conv weight
           (channel order: [node_mat, node_mat^T, edge], like torch.cat)
    returns (B, Co, W) float32
    """
    B, W, _ = adj.shape
    Cn = node.shape[1]
    Ce = edge.shape[1]
    Co = wn.shape[0]

    adj = adj.astype(jnp.float32)

    # Weight folding at trace time (free): u1 = We1@(Wn@node) == (We1@Wn)@node.
    we1 = we[:, :Co]
    we2 = we[:, Co:2 * Co]
    we3 = we[:, 2 * Co:]                                     # (Co, Ce)
    wbig = jnp.concatenate(
        [wn, jnp.dot(we1, wn), jnp.dot(we2, wn)], axis=0)    # (3*Co, Cn)

    kernel = functools.partial(_graph_conv_attn_kernel,
                               dilation=float(dilation), nout=Co,
                               edge_nin=Ce)

    return pl.pallas_call(
        kernel,
        out_shape=jax.ShapeDtypeStruct((B, Co, W), jnp.float32),
        grid_spec=pltpu.PrefetchScalarGridSpec(
            num_scalar_prefetch=0,
            grid=(B,),
            in_specs=[
                pl.BlockSpec((1, W, W), lambda b: (b, 0, 0)),         # adj
                pl.BlockSpec((1, Cn, W), lambda b: (b, 0, 0)),        # node
                pl.BlockSpec((1, Ce, W, W), lambda b: (b, 0, 0, 0)),  # edge
                pl.BlockSpec((3 * Co, Cn), lambda b: (0, 0)),         # fused W
                pl.BlockSpec((Co, Ce), lambda b: (0, 0)),             # We3
            ],
            out_specs=pl.BlockSpec((1, Co, W), lambda b: (b, 0, 0)),
        ),
        compiler_params=pltpu.CompilerParams(
            dimension_semantics=("parallel",)),
    )(adj, node, edge, wbig, we3)


def graph_conv_attn_reference(adj, node, edge, wn, we, *, dilation=1):
    """Pure-JAX transcription of the PyTorch forward, for verification."""
    B, W, _ = adj.shape
    Cn = node.shape[1]
    adj_f = (adj == dilation).astype(jnp.float32)[:, None]          # (B,1,W,W)
    # NodeConvAttn
    node_rep = jnp.broadcast_to(node[:, :, None, :], (B, Cn, W, W)) * adj_f
    node_mat = jnp.einsum('oc,bcij->boij', wn, node_rep)
    # EdgeConvAttn
    pairs = jnp.concatenate(
        [node_mat, jnp.swapaxes(node_mat, -1, -2), edge], axis=1)
    z = jnp.einsum('oc,bcij->boij', we, pairs)
    p = jnp.where(z >= 0, z, 0.2 * z)
    out = p * adj_f
    mask = (adj_f == 0).astype(jnp.float32)
    out = out + (-9e15) * jnp.broadcast_to(mask, out.shape)
    out = jax.nn.softmax(out, axis=-1)
    attn = out * adj_f
    return (node_mat * attn).sum(-1)


if __name__ == "__main__":
    # Small, module-consistent shapes.
    B, W = 2, 16          # batch, number of graph nodes
    node_nin = 8          # node feature channels
    edge_nin = 4          # edge ("dist") feature channels
    nout = 8              # output channels
    dilation = 1

    key = jax.random.PRNGKey(0)
    k_adj, k_node, k_edge, k_wn, k_we = jax.random.split(key, 5)

    # adjacency with integer dilation labels {0,1,2}
    adj = jax.random.randint(k_adj, (B, W, W), 0, 3).astype(jnp.float32)
    node = jax.random.normal(k_node, (B, node_nin, W), dtype=jnp.float32)
    edge = jax.random.normal(k_edge, (B, edge_nin, W, W), dtype=jnp.float32)

    # deterministic Conv2d-style weights (uniform +/- 1/sqrt(fan_in))
    bn = 1.0 / math.sqrt(node_nin)
    be = 1.0 / math.sqrt(edge_nin + 2 * nout)
    wn = jax.random.uniform(k_wn, (nout, node_nin), jnp.float32, -bn, bn)
    we = jax.random.uniform(k_we, (nout, 2 * nout + edge_nin), jnp.float32, -be, be)

    out = graph_conv_attn(adj, node, edge, wn, we, dilation=dilation)
    out = jax.block_until_ready(out)

    ref = graph_conv_attn_reference(adj, node, edge, wn, we, dilation=dilation)
    ref = jax.block_until_ready(ref)

    assert out.shape == (B, nout, W), out.shape
    # Slightly looser tolerance: softmax denominator uses the EUP approximate
    # reciprocal (pl.reciprocal(approx=True)).
    assert jnp.allclose(out, ref, atol=5e-3, rtol=5e-3), (
        float(jnp.max(jnp.abs(out - ref))))

    print("KERNEL_OK")
</pallas_src>

<mosaic_0001>
module attributes {stable_mosaic.version = 11 : i64} {
  func.func @_graph_conv_attn_kernel(%arg0: i32, %arg1: memref<1x16x16xf32, #tpu.memory_space<vmem>>, %arg2: memref<1x8x16xf32, #tpu.memory_space<vmem>>, %arg3: memref<1x4x16x16xf32, #tpu.memory_space<vmem>>, %arg4: memref<24x8xf32, #tpu.memory_space<vmem>>, %arg5: memref<8x4xf32, #tpu.memory_space<vmem>>, %arg6: memref<1x8x16xf32, #tpu.memory_space<vmem>>) attributes {dimension_semantics = [#tpu.dimension_semantics<parallel>], iteration_bounds = array<i64: 2>, scalar_prefetch = 0 : i64, scratch_operands = 0 : i64, tpu.core_type = #tpu.core_type<tc>, window_params = [{transform_indices = @transform_0, window_bounds = array<i64: 1, 16, 16>}, {transform_indices = @transform_1, window_bounds = array<i64: 1, 8, 16>}, {transform_indices = @transform_2, window_bounds = array<i64: 1, 4, 16, 16>}, {pipeline_mode = #tpu.pipeline_mode<synchronous>, transform_indices = @transform_3, window_bounds = array<i64: 24, 8>}, {pipeline_mode = #tpu.pipeline_mode<synchronous>, transform_indices = @transform_4, window_bounds = array<i64: 8, 4>}, {transform_indices = @transform_5, window_bounds = array<i64: 1, 8, 16>}]} {
    %c0 = arith.constant 0 : index
    %c0_0 = arith.constant 0 : index
    %c0_1 = arith.constant 0 : index
    %0 = vector.load %arg1[%c0, %c0_0, %c0_1] : memref<1x16x16xf32, #tpu.memory_space<vmem>>, vector<1x16x16xf32>
    %1 = vector.shape_cast %0 : vector<1x16x16xf32> to vector<16x16xf32>
    %cst = arith.constant 1.000000e+00 : f32
    %2 = vector.broadcast %cst : f32 to vector<16x16xf32>
    %3 = arith.cmpf oeq, %1, %2 : vector<16x16xf32>
    %4 = arith.extui %3 : vector<16x16xi1> to vector<16x16xi32>
    %5 = arith.sitofp %4 : vector<16x16xi32> to vector<16x16xf32>
    %6 = tpu.transpose %5, [1, 0] : vector<16x16xf32> -> vector<16x16xf32>
    %c0_2 = arith.constant 0 : index
    %c0_3 = arith.constant 0 : index
    %c0_4 = arith.constant 0 : index
    %7 = vector.load %arg2[%c0_2, %c0_3, %c0_4] : memref<1x8x16xf32, #tpu.memory_space<vmem>>, vector<1x8x16xf32>
    %8 = vector.shape_cast %7 : vector<1x8x16xf32> to vector<8x16xf32>
    %c0_5 = arith.constant 0 : index
    %c0_6 = arith.constant 0 : index
    %9 = vector.load %arg4[%c0_5, %c0_6] : memref<24x8xf32, #tpu.memory_space<vmem>>, vector<24x8xf32>
    %cst_7 = arith.constant dense<0.000000e+00> : vector<24x16xf32>
    %10 = tpu.matmul %9, %8, %cst_7 {dimension_numbers = #tpu.dot_dimension_numbers<[1], [0], [0], [1], [0, 0, 1, 1], [], []>} : vector<24x8xf32>, vector<8x16xf32>, vector<24x16xf32> -> vector<24x16xf32>
    %11 = vector.extract_strided_slice %10 {offsets = [0, 0], sizes = [8, 16], strides = [1, 1]} : vector<24x16xf32> to vector<8x16xf32>
    %12 = vector.extract_strided_slice %10 {offsets = [8, 0], sizes = [8, 16], strides = [1, 1]} : vector<24x16xf32> to vector<8x16xf32>
    %13 = vector.extract_strided_slice %10 {offsets = [16, 0], sizes = [8, 16], strides = [1, 1]} : vector<24x16xf32> to vector<8x16xf32>
    %c0_8 = arith.constant 0 : index
    %c0_9 = arith.constant 0 : index
    %14 = vector.load %arg5[%c0_8, %c0_9] : memref<8x4xf32, #tpu.memory_space<vmem>>, vector<8x4xf32>
    %c0_10 = arith.constant 0 : index
    %c0_11 = arith.constant 0 : index
    %c0_12 = arith.constant 0 : index
    %c0_13 = arith.constant 0 : index
    %15 = vector.load %arg3[%c0_10, %c0_11, %c0_12, %c0_13] : memref<1x4x16x16xf32, #tpu.memory_space<vmem>>, vector<1x4x16x16xf32>
    %16 = vector.shape_cast %15 : vector<1x4x16x16xf32> to vector<4x16x16xf32>
    %17 = vector.extract_strided_slice %14 {offsets = [0, 0], sizes = [8, 1], strides = [1, 1]} : vector<8x4xf32> to vector<8x1xf32>
    %18 = vector.shape_cast %17 : vector<8x1xf32> to vector<8x1x1xf32>
    %19 = vector.extract_strided_slice %16 {offsets = [0, 0, 0], sizes = [1, 16, 16], strides = [1, 1, 1]} : vector<4x16x16xf32> to vector<1x16x16xf32>
    %20 = vector.shape_cast %19 : vector<1x16x16xf32> to vector<16x16xf32>
    %21 = vector.shape_cast %20 : vector<16x16xf32> to vector<1x16x16xf32>
    %22 = vector.broadcast %18 : vector<8x1x1xf32> to vector<8x16x16xf32>
    %23 = vector.broadcast %21 : vector<1x16x16xf32> to vector<8x16x16xf32>
    %24 = arith.mulf %22, %23 : vector<8x16x16xf32>
    %25 = vector.extract_strided_slice %14 {offsets = [0, 1], sizes = [8, 1], strides = [1, 1]} : vector<8x4xf32> to vector<8x1xf32>
    %26 = vector.shape_cast %25 : vector<8x1xf32> to vector<8x1x1xf32>
    %27 = vector.extract_strided_slice %16 {offsets = [1, 0, 0], sizes = [1, 16, 16], strides = [1, 1, 1]} : vector<4x16x16xf32> to vector<1x16x16xf32>
    %28 = vector.shape_cast %27 : vector<1x16x16xf32> to vector<16x16xf32>
    %29 = vector.shape_cast %28 : vector<16x16xf32> to vector<1x16x16xf32>
    %30 = vector.broadcast %26 : vector<8x1x1xf32> to vector<8x16x16xf32>
    %31 = vector.broadcast %29 : vector<1x16x16xf32> to vector<8x16x16xf32>
    %32 = arith.mulf %30, %31 : vector<8x16x16xf32>
    %33 = arith.addf %24, %32 : vector<8x16x16xf32>
    %34 = vector.extract_strided_slice %14 {offsets = [0, 2], sizes = [8, 1], strides = [1, 1]} : vector<8x4xf32> to vector<8x1xf32>
    %35 = vector.shape_cast %34 : vector<8x1xf32> to vector<8x1x1xf32>
    %36 = vector.extract_strided_slice %16 {offsets = [2, 0, 0], sizes = [1, 16, 16], strides = [1, 1, 1]} : vector<4x16x16xf32> to vector<1x16x16xf32>
    %37 = vector.shape_cast %36 : vector<1x16x16xf32> to vector<16x16xf32>
    %38 = vector.shape_cast %37 : vector<16x16xf32> to vector<1x16x16xf32>
    %39 = vector.broadcast %35 : vector<8x1x1xf32> to vector<8x16x16xf32>
    %40 = vector.broadcast %38 : vector<1x16x16xf32> to vector<8x16x16xf32>
    %41 = arith.mulf %39, %40 : vector<8x16x16xf32>
    %42 = arith.addf %33, %41 : vector<8x16x16xf32>
    %43 = vector.extract_strided_slice %14 {offsets = [0, 3], sizes = [8, 1], strides = [1, 1]} : vector<8x4xf32> to vector<8x1xf32>
    %44 = vector.shape_cast %43 : vector<8x1xf32> to vector<8x1x1xf32>
    %45 = vector.extract_strided_slice %16 {offsets = [3, 0, 0], sizes = [1, 16, 16], strides = [1, 1, 1]} : vector<4x16x16xf32> to vector<1x16x16xf32>
    %46 = vector.shape_cast %45 : vector<1x16x16xf32> to vector<16x16xf32>
    %47 = vector.shape_cast %46 : vector<16x16xf32> to vector<1x16x16xf32>
    %48 = vector.broadcast %44 : vector<8x1x1xf32> to vector<8x16x16xf32>
    %49 = vector.broadcast %47 : vector<1x16x16xf32> to vector<8x16x16xf32>
    %50 = arith.mulf %48, %49 : vector<8x16x16xf32>
    %51 = arith.addf %42, %50 : vector<8x16x16xf32>
    %52 = vector.shape_cast %5 : vector<16x16xf32> to vector<1x16x16xf32>
    %53 = vector.shape_cast %12 : vector<8x16xf32> to vector<8x1x16xf32>
    %54 = vector.broadcast %52 : vector<1x16x16xf32> to vector<8x16x16xf32>
    %55 = vector.broadcast %53 : vector<8x1x16xf32> to vector<8x16x16xf32>
    %56 = arith.mulf %54, %55 : vector<8x16x16xf32>
    %57 = arith.addf %51, %56 : vector<8x16x16xf32>
    %58 = vector.shape_cast %6 : vector<16x16xf32> to vector<1x16x16xf32>
    %59 = vector.shape_cast %13 : vector<8x16xf32> to vector<8x16x1xf32>
    %60 = vector.broadcast %58 : vector<1x16x16xf32> to vector<8x16x16xf32>
    %61 = vector.broadcast %59 : vector<8x16x1xf32> to vector<8x16x16xf32>
    %62 = arith.mulf %60, %61 : vector<8x16x16xf32>
    %63 = arith.addf %57, %62 : vector<8x16x16xf32>
    %cst_14 = arith.constant 0.000000e+00 : f32
    %64 = vector.broadcast %cst_14 : f32 to vector<8x16x16xf32>
    %65 = arith.cmpf oge, %63, %64 : vector<8x16x16xf32>
    %cst_15 = arith.constant 2.000000e-01 : f32
    %66 = vector.broadcast %cst_15 : f32 to vector<8x16x16xf32>
    %67 = arith.mulf %66, %63 : vector<8x16x16xf32>
    %68 = arith.select %65, %63, %67 : vector<8x16x16xi1>, vector<8x16x16xf32>
    %69 = vector.shape_cast %5 : vector<16x16xf32> to vector<1x16x16xf32>
    %cst_16 = arith.constant 0.000000e+00 : f32
    %70 = vector.broadcast %cst_16 : f32 to vector<1x16x16xf32>
    %71 = arith.cmpf ogt, %69, %70 : vector<1x16x16xf32>
    %cst_17 = arith.constant -9.000000e+15 : f32
    %72 = vector.shape_cast %71 : vector<1x16x16xi1> to vector<1x16x16xi1>
    %73 = vector.broadcast %72 : vector<1x16x16xi1> to vector<8x16x16xi1>
    %74 = vector.broadcast %cst_17 : f32 to vector<8x16x16xf32>
    %75 = arith.select %73, %68, %74 : vector<8x16x16xi1>, vector<8x16x16xf32>
    %cst_18 = arith.constant dense<0xFF800000> : vector<8x16xf32>
    %76 = vector.multi_reduction <maximumf>, %75, %cst_18 [2] : vector<8x16x16xf32> to vector<8x16xf32>
    %77 = vector.shape_cast %76 : vector<8x16xf32> to vector<8x16x1xf32>
    %78 = vector.broadcast %77 : vector<8x16x1xf32> to vector<8x16x16xf32>
    %79 = arith.subf %75, %78 : vector<8x16x16xf32>
    %80 = math.exp %79 : vector<8x16x16xf32>
    %cst_19 = arith.constant dense<0.000000e+00> : vector<8x16xf32>
    %81 = vector.multi_reduction <add>, %80, %cst_19 [2] : vector<8x16x16xf32> to vector<8x16xf32>
    %82 = vector.shape_cast %81 : vector<8x16xf32> to vector<8x16x1xf32>
    %83 = tpu.reciprocal %82 {approx = true} : vector<8x16x1xf32> -> vector<8x16x1xf32>
    %84 = vector.broadcast %83 : vector<8x16x1xf32> to vector<8x16x16xf32>
    %85 = arith.mulf %80, %84 : vector<8x16x16xf32>
    %86 = vector.shape_cast %5 : vector<16x16xf32> to vector<1x16x16xf32>
    %87 = vector.broadcast %86 : vector<1x16x16xf32> to vector<8x16x16xf32>
    %88 = arith.mulf %85, %87 : vector<8x16x16xf32>
    %89 = vector.shape_cast %11 : vector<8x16xf32> to vector<8x1x16xf32>
    %90 = vector.broadcast %89 : vector<8x1x16xf32> to vector<8x16x16xf32>
    %91 = arith.mulf %88, %90 : vector<8x16x16xf32>
    %cst_20 = arith.constant dense<0.000000e+00> : vector<8x16xf32>
    %92 = vector.multi_reduction <add>, %91, %cst_20 [2] : vector<8x16x16xf32> to vector<8x16xf32>
    %c0_21 = arith.constant 0 : index
    %c0_22 = arith.constant 0 : index
    %c0_23 = arith.constant 0 : index
    %93 = vector.load %arg6[%c0_21, %c0_22, %c0_23] : memref<1x8x16xf32, #tpu.memory_space<vmem>>, vector<1x8x16xf32>
    %94 = vector.shape_cast %93 : vector<1x8x16xf32> to vector<8x16xf32>
    %95 = vector.shape_cast %92 : vector<8x16xf32> to vector<1x8x16xf32>
    tpu.vector_store %arg6[%c0_21, %c0_22, %c0_23], %95 {strides = array<i32>} : memref<1x8x16xf32, #tpu.memory_space<vmem>>, vector<1x8x16xf32>,
    return
  }
  func.func @transform_0(%arg0: i32) -> (i32, i32, i32) {
    %c0_i32 = arith.constant 0 : i32
    %c0_i32_0 = arith.constant 0 : i32
    %c0_i32_1 = arith.constant 0 : i32
    return %arg0, %c0_i32, %c0_i32_0 : i32, i32, i32
  }
  func.func @transform_1(%arg0: i32) -> (i32, i32, i32) {
    %c0_i32 = arith.constant 0 : i32
    %c0_i32_0 = arith.constant 0 : i32
    %c0_i32_1 = arith.constant 0 : i32
    return %arg0, %c0_i32, %c0_i32_0 : i32, i32, i32
  }
  func.func @transform_2(%arg0: i32) -> (i32, i32, i32, i32) {
    %c0_i32 = arith.constant 0 : i32
    %c0_i32_0 = arith.constant 0 : i32
    %c0_i32_1 = arith.constant 0 : i32
    %c0_i32_2 = arith.constant 0 : i32
    return %arg0, %c0_i32, %c0_i32_0, %c0_i32_1 : i32, i32, i32, i32
  }
  func.func @transform_3(%arg0: i32) -> (i32, i32) {
    %c0_i32 = arith.constant 0 : i32
    %c0_i32_0 = arith.constant 0 : i32
    %c0_i32_1 = arith.constant 0 : i32
    return %c0_i32, %c0_i32_0 : i32, i32
  }
  func.func @transform_4(%arg0: i32) -> (i32, i32) {
    %c0_i32 = arith.constant 0 : i32
    %c0_i32_0 = arith.constant 0 : i32
    %c0_i32_1 = arith.constant 0 : i32
    return %c0_i32, %c0_i32_0 : i32, i32
  }
  func.func @transform_5(%arg0: i32) -> (i32, i32, i32) {
    %c0_i32 = arith.constant 0 : i32
    %c0_i32_0 = arith.constant 0 : i32
    %c0_i32_1 = arith.constant 0 : i32
    return %arg0, %c0_i32, %c0_i32_0 : i32, i32, i32
  }
}

</mosaic_0001>

<bundles_post_ra>
// kernel: tpu_custom_call.1
= control target key start
LH: loop header
LB: loop body
LE: loop exit
PB: predicated region body
PF: predicated region fallthrough
CT: control target
= control target key end

     0   :  { %10 = vsyncpa [#allocation3], 0  ;;  %s2886_s0 = inlined_call_operand.vmem [shape: f32[2,16,16], index: 0, kind: input, shape index: {}]   ;;  %s2887_s1 = inlined_call_operand.hbm [shape: f32[2,8,16], index: 1, kind: input, shape index: {}]   ;;  %s2888_s2 = inlined_call_operand.hbm [shape: f32[2,4,16,16], index: 2, kind: input, shape index: {}]   ;;  %s2889_s3 = inlined_call_operand.vmem [shape: f32[24,8], index: 3, kind: input, shape index: {}]   ;;  %s2890_s4 = inlined_call_operand.vmem [shape: f32[8,4], index: 4, kind: input, shape index: {}]   ;;  %s2891_s5 = inlined_call_operand.hbm [shape: f32[2,8,16], index: 5, kind: output, shape index: {}]  }
   0x1   :  { %12 = vsyncpa [#allocation3 + $0x1], 0 }
   0x2   :  { %13 = vsyncpa [#allocation6], 0 }
   0x3   :  { %15 = vsyncpa [#allocation6 + $0x1], 0 }
   0x4   :  { %16 = vsyncpa [#allocation4], 0 }
   0x5   :  { %18 = vsyncpa [#allocation4 + $0x1], 0  ;;  %s2010_s18 = smov 0   ;;  %s2012_s19 = smov 0  }
   0x6   :  { %s2014_s20 = smov 0   ;;  %s2016_s21 = smov 0  }
   0x7 LB: > { %s2031_s22 = sadd.s32 4294967295, %s1966_s21   ;;  %s1651_s23 = sadd.s32 4294967294, %s1966_s21   ;;  %s1966_s21 = sphi %s2016_s21, %s2913_s21   ;;  %s1962_s20 = sphi %s2014_s20, %s2912_s20   ;;  %s1958_s19 = sphi %s2012_s19, %s2911_s19   ;;  %s1954_s18 = sphi %s2010_s18, %s2910_s18  }
   0x8   : > { %s2035_s24 = sadd.s32 1, %s1966_s21   ;;  %s57_s25 = sadd.s32 1, %s1962_s20 }
   0x9   : > { %s54_s26 = ssub.s32 %s1966_s21, %s2035_s24  ;;  %p64_p0 = scmp.ne.s32.totalorder %s1962_s20, %s1958_s19 }
   0xa   : > { %p55_p1 = scmp.eq.s32.totalorder %s54_s26, 0  ;;  %p65_p2 = scmp.eq.s32.totalorder %s1966_s21, 0 }
   0xb   : > { %p70_p3 = scmp.ne.s32.totalorder %s1958_s19, %s1954_s18  ;;  %p71_p4 = scmp.eq.s32.totalorder %s2031_s22, 0 }
   0xc   : > { %s2047_s27 = scalar_select %p55_p1, %s1962_s20, %s57_s25  }
   0xd   : > { %p2049_p5 = por %p65_p2, %p64_p0  ;;  %p2053_p6 = por %p71_p4, %p70_p3 }
   0xe   : > { %p162_p7 = scmp.eq.s32.totalorder %s2031_s22, 1  ;;  %p168_p8 = scmp.eq.s32.totalorder %s1651_s23, 1 }
   0xf   : > { %s2896_s29 = scalar_select %p2053_p6, 1, 0 }
  0x10   : > { %p1710_p10 = scmp.lt.s32.totalorder %s1966_s21, 2  ;;  %p2060_p11 = por %p162_p7, %p64_p0 }
  0x11   : > { %p2064_p12 = por %p168_p8, %p70_p3  ;;  %s2069_s7 = sand.u32 1, %s1962_s20  }
  0x12   : > { %s2897_s30 = scalar_select %p2060_p11, 1, 0 }
  0x13   : > { %s2898_s6 = scalar_select %p2064_p12, 1, 0 }
  0x14   : > { %s1655_s8 = sshll.u32 %s1966_s21, 7  ;;  %s1654_s9 = sshll.u32 %s2069_s7, 3 }
  0x15   : > { %s2076_s12 = scalar_lea.hbm %s2887_s1, %s1655_s8  ;;  %s206_s13 = scalar_lea.vmem [#allocation2], %s1654_s9 }
  0x16   : > { %s213_s14 = sshll.u32 %s206_s13, 4  ;;  %p2080_p13 = pnand %p1710_p10, %p2049_p5  ;;  %s2084_s14 = int_to_ptr.vmem [resolvable:$true] %s213_s14 }
  0x17   : > { %s203_s16 = scalar_lea.sflag [#allocation3], %s2069_s7  ;;  %s1836_s17 = scalar_lea.hbm %s2076_s12, 128 }
  0x18   : > { %p1837_p2 = scmp.ne.s32.totalorder %s2076_s12, %s1836_s17  ;;  %p1838_p3 = pneg %p2080_p13 }
  0x19   : > { %s1841_s26 = scalar_lea.hbm %s2887_s1, 256  ;;  %p1842_p5 = scmp.lt.u32.totalorder %s2076_s12, %s2887_s1 }
  0x1a   : > { %p1839_p4 = pnand %p1838_p3, %p1837_p2  ;;  %p1843_p8 = scmp.lt.u32.totalorder %s1841_s26, %s1836_s17 }
  0x1b   : > { %p1845_p9 = scmp.lt.u32.totalorder %s1836_s17, %s2076_s12 }
  0x1c   : > { %p1840_p7 = pneg %p1839_p4  ;;  %p1844_p10 = por %p1843_p8, %p1842_p5 }
  0x1e   : > { %p1846_p0 = por %p1845_p9, %p1844_p10 }
  0x20   : > { %p1847_p1 = pnand %p1846_p0, %p1840_p7 }
  0x22   : > { %1850 = shalt.err (!%p1847_p1)
}
  0x23   : > { %s1851_s9 = scalar_lea.vmem %s2084_s14, 128  ;;  %s1968_s10 = smov [#allocation2]  }
  0x24   : > { %p1852_p2 = scmp.ne.s32.totalorder %s2084_s14, %s1851_s9  ;;  %s1856_s11 = sshll.u32 %s1968_s10, 4  ;;  %s1857_s11 = int_to_ptr.vmem [resolvable:$false] %s1856_s11 }
  0x25   : > { %s1858_s13 = scalar_lea.vmem %s1857_s11, 256  ;;  %p1859_p11 = scmp.lt.s32.totalorder %s2084_s14, %s1857_s11 }
  0x26   : > { %p1854_p4 = pnand %p1852_p2, %p1838_p3  ;;  %p1860_p5 = scmp.lt.s32.totalorder %s1858_s13, %s1851_s9 }
  0x28   : > { %p1855_p12 = pneg %p1854_p4  ;;  %p1861_p8 = por %p1860_p5, %p1859_p11 }
  0x2a   : > { %p1862_p9 = pnand %p1861_p8, %p1855_p12 }
  0x2c   : > { %1865 = shalt.err (!%p1862_p9)
}
  0x2d   : > { %1702 = dma.hbm_to_vmem [thread:$0]  (!%p2080_p13), %s2076_s12, 128, %s2084_s14, %s203_s16  }
  0x2e   : > { %p2900_p0 = scmp.lt.s32.totalorder %s1966_s21, 3  ;;  %p2901_p1 = scmp.ge.s32.totalorder %s1966_s21, 1 }
  0x2f   : > { %s1656_s23 = sshll.u32 %s2069_s7, 6  ;;  %s1674_s25 = sshll.u32 %s1966_s21, 10 }
  0x30   : > { %p2118_p7 = pnand %p2901_p1, %p2900_p0  ;;  %s2127_s8 = scalar_lea.hbm %s2888_s2, %s1674_s25 }
  0x31   : > { %s224_s9 = scalar_lea.vmem [#allocation5], %s1656_s23  ;;  %s221_s12 = scalar_lea.sflag [#allocation6], %s2069_s7 }
  0x32   : > { %s231_s10 = sshll.u32 %s224_s9, 4  ;;  %s1866_s14 = scalar_lea.hbm %s2127_s8, 1024  ;;  %s2129_s10 = int_to_ptr.vmem [resolvable:$true] %s231_s10 }
  0x33   : > { %p1867_p11 = scmp.ne.s32.totalorder %s2127_s8, %s1866_s14  ;;  %s1871_s13 = scalar_lea.hbm %s2888_s2, 2048 }
  0x34   : > { %p1872_p2 = scmp.lt.u32.totalorder %s2127_s8, %s2888_s2  ;;  %p1873_p4 = scmp.lt.u32.totalorder %s1871_s13, %s1866_s14 }
  0x35   : > { %p1869_p12 = pnand %p1867_p11, %p1838_p3  ;;  %p1875_p8 = scmp.lt.u32.totalorder %s1866_s14, %s2127_s8 }
  0x36   : > { %p1874_p5 = por %p1873_p4, %p1872_p2 }
  0x37   : > { %p1870_p10 = pneg %p1869_p12 }
  0x38   : > { %p1876_p9 = por %p1875_p8, %p1874_p5 }
  0x3a   : > { %p1877_p0 = pnand %p1876_p9, %p1870_p10 }
  0x3c   : > { %1880 = shalt.err (!%p1877_p0)
}
  0x3d   : > { %s1881_s23 = scalar_lea.vmem %s2129_s10, 1024  ;;  %s1969_s28 = smov [#allocation5]  }
  0x3e   : > { %p1882_p1 = scmp.ne.s32.totalorder %s2129_s10, %s1881_s23  ;;  %s1886_s9 = sshll.u32 %s1969_s28, 4  ;;  %s1887_s9 = int_to_ptr.vmem [resolvable:$false] %s1886_s9 }
  0x3f   : > { %s1888_s16 = scalar_lea.vmem %s1887_s9, 2048  ;;  %p1889_p6 = scmp.lt.s32.totalorder %s2129_s10, %s1887_s9 }
  0x40   : > { %p1884_p11 = pnand %p1882_p1, %p1838_p3  ;;  %p1890_p2 = scmp.lt.s32.totalorder %s1888_s16, %s1881_s23 }
  0x42   : > { %p1885_p12 = pneg %p1884_p11  ;;  %p1891_p4 = por %p1890_p2, %p1889_p6 }
  0x44   : > { %p1892_p5 = pnand %p1891_p4, %p1885_p12 }
  0x46   : > { %1895 = shalt.err (!%p1892_p5)
}
  0x47   : > { %s1970_s14 = smov 128   ;;  %s1971_s11 = smov 8  }
  0x48   : > { %1705 = dma.hbm_to_vmem [thread:$0]  (!%p2080_p13), %s2127_s8, 1024, %s2129_s10, %s221_s12, %s1970_s14, %s1970_s14, %s1971_s11  }
  0x49   : > { %243 = sbr.rel (%p2118_p7) target bundleno = 1035 (0x40b), region = 40  ;;  %s2160_s13 = sand.u32 (!%p2118_p7), 1, %s1958_s19  }
  0x4a   : > { %s1660_s25 = sshll.u32 (!%p2118_p7), %s2160_s13, 3  ;;  %s246_s26 = scalar_lea.sflag (!%p2118_p7), [#allocation3], %s2160_s13 }
  0x4b   : > { %s249_s23 = scalar_lea.vmem (!%p2118_p7), [#allocation2], %s1660_s25  ;;  %p2903_p6 = scmp.ne.s32.totalorder (!%p2118_p7), %s2896_s29, 0 }
  0x50   : > { %1941 = dma.done.wait (%p2903_p6), %s246_s26, 128  }
  0x51   : > { %1943 = vsyncadd (%p2903_p6), %s246_s26, 4294967168  ;;  %s1661_s7 = sshll.u32 %s2160_s13, 6  ;;  %s255_s15 = scalar_lea.sflag [#allocation6], %s2160_s13 }
  0x52   : > { %s2172_s17 = scalar_lea.vmem [#allocation5], %s1661_s7 }
  0x53   : > { %1945 = dma.done.wait (%p2903_p6), %s255_s15, 1024  }
  0x54   : > { %1947 = vsyncadd (%p2903_p6), %s255_s15, 4294966272  ;;  %v1972_v0 = vmov 0.0   ;;  %vm1973_vm0 = vmmov 0   ;;  %v2894_v1 = vlaneseq  ;;  %v1974_v2 = vmov 1   ;;  %v340_v8 = vld [vmem:[%s249_s23] sm:$0xff]  ;;  %v343_v14 = vld [vmem:[%s2889_s3 + $0x10] sm:$0xff] }
  0x55   : > { %1691 = vmatprep.subr.mxu1 %v1972_v0  ;;  %1685 = vmatprep.mubr.msk.f32.mxu1 %vm1973_vm0, %v1972_v0  ;;  %v1975_v3 = vmov 1966171168   ;;  %vm344_vm1 = vcmask 64512   ;;  %v342_v9 = vld [vmem:[%s2889_s3 + $0x8] sm:$0xff]  ;;  %v434_v10 = vld [vmem:[%s2890_s4] sm:$0xff]  ;;  %v1976_v31 = vmov 2  }
  0x56   : > { %1753 = vset.pattern.permute.xlu1 %v1974_v2  ;;  %v446_v4 = vunpack.c.l.s4 %v1975_v3  ;;  %1757 = vset.pattern.permute.xlu0 %v1974_v2  ;;  %v2184_v5 = vshrl.u32 %v2894_v1, 7  ;;  %v444_v13 = vcombine.high %v434_v10, %v434_v10  ;;  %v1977_v33 = vmov 0   ;;  %v2245_v50 = vld [vmem:[%s2172_s17 + $0x10] sm:$0xff]  ;;  %v2248_v51 = vld [vmem:[%s2172_s17 + $0x18] sm:$0xff]  ;;  %v2251_v52 = vld [vmem:[%s2172_s17] sm:$0xff]  ;;  %p295_p13 = scmp.lt.s32.totalorder %s2031_s22, 1 }
  0x57   : > { %1680 = vmatprep.subr.mxu0 %v1972_v0  ;;  %1682 = vmatprep.mubr.msk.f32.mxu0 %vm1973_vm0, %v1972_v0  ;;  %v1978_v36 = vmov 3   ;;  %v2254_v53 = vld [vmem:[%s2172_s17 + $0x8] sm:$0xff]  ;;  %v2268_v3 = vld [vmem:[%s2172_s17 + $0x20] sm:$0xff]  ;;  %vm1077_vm5 = vcmask 130048   ;;  %s294_s29 = scalar_lea.vmem [#allocation7], %s1660_s25  ;;  %p2907_p7 = scmp.ne.s32.totalorder %s2897_s30, 0 }
  0x58   : > { %v447_v6 = vunpack.c.0.s8 %v446_v4  ;;  %1692 = vmatpush3.msra.mxu1 %v340_v8  ;;  %1681 = vmatpush3.msra.mxu0 %v340_v8  ;;  %v2201_v12 = vsub.s32 0, %v2184_v5  ;;  %v2265_v62 = vld [vmem:[%s2172_s17 + $0x28] sm:$0xff]  ;;  %s296_s16 = scalar_select %p295_p13, %s2031_s22, 1 }
  0x59   : > { %1686 = vmatmul.mubr.msk.f32.vlgmr.msra.gmra.mrb[0].mxu1 %vm344_vm1, %v342_v9  ;;  %s1546_s8 = sshll.u32 %s294_s29, 4  ;;  %s1979_s9 = smov [#allocation7]   ;;  %s2843_s8 = int_to_ptr.vmem [resolvable:$true] %s1546_s8 }
  0x5a   : > { %v2190_v7 = vsub.s32 %v447_v6, %v2184_v5  ;;  %1688 = vmatprep.mubr.msk.f32.mxu1 %vm1973_vm0, %v1972_v0  ;;  %s1675_s14 = sshll.u32 %s296_s16, 4  ;;  %s1896_s25 = scalar_lea.vmem %s2843_s8, 128 }
  0x5b   : > { %s299_s23 = scalar_lea.vmem %s2886_s0, %s1675_s14  ;;  %p1897_p3 = scmp.ne.s32.totalorder %s2843_s8, %s1896_s25 }
  0x5c   : > { %v451_v11 = vrot.slane %v434_v10, %v2190_v7  ;;  %v458_v17 = vrot.slane %v444_v13, %v2190_v7  ;;  %s1900_s16 = sshll.u32 %s1979_s9, 4  ;;  %s1901_s16 = int_to_ptr.vmem [resolvable:$false] %s1900_s16 }
  0x5d   : > { %1689 = vmatmul.mubr.msk.f32.gmra.mrb[2].mxu1 %vm344_vm1, %v343_v14  ;;  %p1898_p10 = pnand %p1897_p3, %p2907_p7  ;;  %s1902_s14 = scalar_lea.vmem %s1901_s16, 256 }
  0x5e   : > { %v467_v15 = vrot.slane %v451_v11, %v2190_v7  ;;  %v459_v16 = vcombine.high %v451_v11, %v451_v11  ;;  %v474_v20 = vrot.slane %v458_v17, %v2190_v7  ;;  %v460_v21 = vcombine.high %v458_v17, %v458_v17  ;;  %p1903_p9 = scmp.lt.s32.totalorder %s2843_s8, %s1901_s16  ;;  %p1904_p0 = scmp.lt.s32.totalorder %s1902_s14, %s1896_s25 }
  0x5f   : > { %p1899_p8 = pneg %p1898_p10 }
  0x60   : > { %v496_v18 = vrot.slane %v467_v15, %v2201_v12  ;;  %v481_v19 = vrot.slane %v459_v16, %v2190_v7  ;;  %v489_v23 = vcombine.high %v467_v15, %v467_v15  ;;  %v512_v24 = vrot.slane %v474_v20, %v2201_v12  ;;  %v2279_v15 = vld [vmem:[%s2172_s17 + $0x38] sm:$0xff]  ;;  %p1905_p1 = por %p1904_p0, %p1903_p9 }
  0x61   : > { %v488_v25 = vrot.slane %v460_v21, %v2190_v7  ;;  %v490_v26 = vcombine.high %v474_v20, %v474_v20 }
  0x62   : > { %574 = vperm.xlu1 %1753, %v496_v18   ;;  %v500_v22 = vrot.slane %v481_v19, %v2201_v12  ;;  %590 = vperm.xlu0 %1757, %v512_v24   ;;  %v504_v27 = vrot.slane %v489_v23, %v2201_v12  ;;  %v491_v30 = vcombine.high %v481_v19, %v481_v19  ;;  %p1906_p11 = pnand %p1905_p1, %p1899_p8 }
  0x63   : > { %v516_v28 = vrot.slane %v488_v25, %v2201_v12  ;;  %v520_v29 = vrot.slane %v490_v26, %v2201_v12  ;;  %v492_v34 = vcombine.high %v488_v25, %v488_v25 }
  0x64   : > { %v508_v32 = vrot.slane %v491_v30, %v2201_v12 }
  0x65   : > { %v524_v35 = vrot.slane %v492_v34, %v2201_v12 }
  0x66   : > { %578 = vperm.xlu1 %1753, %v500_v22   ;;  %594 = vperm.xlu0 %1757, %v516_v28  }
  0x6a   : > { %582 = vperm.xlu1 %1753, %v504_v27   ;;  %598 = vperm.xlu0 %1757, %v520_v29  }
  0x6e   : > { %1754 = vset.pattern.permute.xlu1 %v1976_v31  ;;  %1763 = vset.pattern.permute.xlu0 %v1977_v33 }
  0x6f   : > { %642 = vperm.xlu1 %1754, %v500_v22   ;;  %526 = vperm.xlu0 %1763, %v496_v18  }
  0x73   : > { %1755 = vset.pattern.permute.xlu1 %v1974_v2  ;;  %530 = vperm.xlu0 %1763, %v500_v22  }
  0x74   : > { %586 = vperm.xlu1 %1755, %v508_v32  }
  0x77   : > { %534 = vperm.xlu0 %1763, %v504_v27  }
  0x78   : > { %1756 = vset.pattern.permute.xlu1 %v1977_v33 }
  0x79   : > { %542 = vperm.xlu1 %1756, %v512_v24  }
  0x7b   : > { %538 = vperm.xlu0 %1763, %v508_v32  }
  0x7d   : > { %1758 = vset.pattern.permute.xlu1 %v1976_v31 }
  0x7e   : > { %646 = vperm.xlu1 %1758, %v504_v27  }
  0x7f   : > { %554 = vperm.xlu0 %1763, %v524_v35  }
  0x82   : > { %1759 = vset.pattern.permute.xlu1 %v1977_v33 }
  0x83   : > { %546 = vperm.xlu1 %1759, %v516_v28   ;;  %1766 = vset.pattern.permute.xlu0 %v1976_v31 }
  0x84   : > { %638 = vperm.xlu0 %1766, %v496_v18  }
  0x87   : > { %1760 = vset.pattern.permute.xlu1 %v1976_v31 }
  0x88   : > { %650 = vperm.xlu1 %1760, %v508_v32   ;;  %666 = vperm.xlu0 %1766, %v524_v35  }
  0x8c   : > { %1761 = vset.pattern.permute.xlu1 %v1978_v36  ;;  %1770 = vset.pattern.permute.xlu0 %v1978_v36 }
  0x8d   : > { %706 = vperm.xlu1 %1761, %v500_v22   ;;  %702 = vperm.xlu0 %1770, %v496_v18  }
  0x91   : > { %1762 = vset.pattern.permute.xlu1 %v1977_v33  ;;  %714 = vperm.xlu0 %1770, %v508_v32  }
  0x92   : > { %550 = vperm.xlu1 %1762, %v520_v29  }
  0x95   : > { %730 = vperm.xlu0 %1770, %v524_v35  }
  0x96   : > { %1764 = vset.pattern.permute.xlu1 %v1976_v31 }
  0x97   : > { %654 = vperm.xlu1 %1764, %v512_v24  }
  0x9b   : > { %1765 = vset.pattern.permute.xlu1 %v1978_v36 }
  0x9c   : > { %710 = vperm.xlu1 %1765, %v504_v27  }
  0xa0   : > { %1767 = vset.pattern.permute.xlu1 %v1974_v2 }
  0xa1   : > { %602 = vperm.xlu1 %1767, %v524_v35  }
  0xa5   : > { %1768 = vset.pattern.permute.xlu1 %v1976_v31 }
  0xa6   : > { %658 = vperm.xlu1 %1768, %v516_v28  }
  0xaa   : > { %662 = vperm.xlu1 %1768, %v520_v29  }
  0xae   : > { %1769 = vset.pattern.permute.xlu1 %v1978_v36 }
  0xaf   : > { %718 = vperm.xlu1 %1769, %v512_v24  }
  0xb3   : > { %722 = vperm.xlu1 %1769, %v516_v28  }
  0xb7   : > { %726 = vperm.xlu1 %1769, %v520_v29  }
  0xe1   : > { %v2224_v37 = vpop.permute.xlu1 %574  ;;  %v591_v38 = vpop.permute.xlu0 %590 }
  0xe2   : > { %v613_v23 = vmul.f32 %v591_v38, %v2245_v50  ;;  %v614_v24 = vmul.f32 %v591_v38, %v2248_v51 }
  0xe5   : > { %v2226_v39 = vpop.permute.xlu1 %578  ;;  %v2228_v40 = vpop.permute.xlu0 %594 }
  0xe6   : > { %v608_v60 = vmul.f32 %v2226_v39, %v2248_v51 }
  0xe9   : > { %v2230_v41 = vpop.permute.xlu1 %582  ;;  %v2232_v42 = vpop.permute.xlu0 %598 }
  0xea   : > { %v617_v19 = vmul.f32 %v2232_v42, %v2245_v50 }
  0xee   : > { %v2234_v43 = vpop.permute.xlu1 %642  ;;  %v2236_v44 = vpop.permute.xlu0 %526 }
  0xef   : > { %v672_v4 = vmul.f32 %v2234_v43, %v2265_v62 }
  0xf2   : > { %v2238_v46 = vpop.permute.xlu0 %530 }
  0xf3   : > { %v587_v45 = vpop.permute.xlu1 %586  ;;  %v560_v61 = vmul.f32 %v2238_v46, %v2254_v53 }
  0xf4   : > { %v611_v55 = vmul.f32 %v587_v45, %v2245_v50  ;;  %v612_v56 = vmul.f32 %v587_v45, %v2248_v51 }
  0xf5   : > { %v624_v8 = vadd.f32 %v608_v60, %v560_v61 }
  0xf6   : > { %v2240_v48 = vpop.permute.xlu0 %534 }
  0xf7   : > { %v688_v14 = vadd.f32 %v672_v4, %v624_v8  ;;  %v558_v4 = vmul.f32 %v2236_v44, %v2254_v53  ;;  %v561_v8 = vmul.f32 %v2240_v48, %v2251_v52 }
  0xf8   : > { %v543_v47 = vpop.permute.xlu1 %542 }
  0xf9   : > { %v565_v21 = vmul.f32 %v543_v47, %v2251_v52  ;;  %v566_v22 = vmul.f32 %v543_v47, %v2254_v53 }
  0xfa   : > { %v539_v54 = vpop.permute.xlu0 %538 }
  0xfb   : > { %v563_v58 = vmul.f32 %v539_v54, %v2251_v52  ;;  %v564_v59 = vmul.f32 %v539_v54, %v2254_v53  ;;  %v629_v28 = vadd.f32 %v613_v23, %v565_v21  ;;  %v630_v29 = vadd.f32 %v614_v24, %v566_v22  ;;  %v301_v23 = vld [vmem:[%s299_s23 + $0x8] sm:$0xff] }
  0xfc   : > { %v610_v21 = vmul.f32 %v2230_v41, %v2248_v51  ;;  %v562_v22 = vmul.f32 %v2240_v48, %v2254_v53  ;;  %vm303_vm3 = vcmp.eq.f32.partialorder %v301_v23, 1.0 }
  0xfd   : > { %v2242_v49 = vpop.permute.xlu1 %646  ;;  %v627_v63 = vadd.f32 %v611_v55, %v563_v58  ;;  %v628_v2 = vadd.f32 %v612_v56, %v564_v59  ;;  %v615_v55 = vmul.f32 %v2228_v40, %v2245_v50  ;;  %v616_v56 = vmul.f32 %v2228_v40, %v2248_v51 }
  0xfe   : > { %v2289_v20 = vpop.permute.xlu0 %554  ;;  %v674_v48 = vmul.f32 %v2242_v49, %v2265_v62 }
  0xff   : > { %v571_v45 = vmul.f32 %v2289_v20, %v2251_v52 }
 0x102   : > { %v547_v57 = vpop.permute.xlu1 %546 }
 0x103   : > { %v2296_v31 = vpop.permute.xlu0 %638  ;;  %v567_v47 = vmul.f32 %v547_v57, %v2251_v52  ;;  %v568_v54 = vmul.f32 %v547_v57, %v2254_v53  ;;  %v606_v57 = vmul.f32 %v2224_v37, %v2248_v51 }
 0x105   : > { %v631_v40 = vadd.f32 %v615_v55, %v567_v47  ;;  %v622_v24 = vadd.f32 %v606_v57, %v558_v4  ;;  %v618_v47 = vmul.f32 %v2232_v42, %v2248_v51  ;;  %v2355_v55 = vld [vmem:[%s2172_s17 + $0x30] sm:$0xff]  ;;  %v2369_v4 = vsel %vm303_vm3, 1.0, %v1972_v0  ;;  %s1671_s17 = sshll.u32 %s2031_s22, 7  ;;  %s1533_s22 = scalar_lea.sflag [#allocation4], %s2160_s13 }
 0x106   : > { %vm1056_vm8 = vcmp.gt.f32.partialorder %v2369_v4, 0.0  ;;  %s2841_s28 = scalar_lea.hbm %s2891_s5, %s1671_s17 }
 0x107   : > { %v651_v6 = vpop.permute.xlu1 %650  ;;  %v2305_v38 = vpop.permute.xlu0 %666 }
 0x108   : > { %v675_v9 = vmul.f32 %v651_v6, %v2268_v3  ;;  %v676_v10 = vmul.f32 %v651_v6, %v2265_v62  ;;  %v683_v60 = vmul.f32 %v2305_v38, %v2268_v3  ;;  %v609_v6 = vmul.f32 %v2230_v41, %v2245_v50 }
 0x10a   : > { %v2274_v11 = vadd.f32 %v675_v9, %v627_v63  ;;  %v2276_v13 = vadd.f32 %v676_v10, %v628_v2  ;;  %v632_v2 = vadd.f32 %v616_v56, %v568_v54  ;;  %v626_v54 = vadd.f32 %v610_v21, %v562_v22 }
 0x10c   : > { %v2281_v16 = vpop.permute.xlu1 %706  ;;  %v2322_v61 = vpop.permute.xlu0 %702 }
 0x10d   : > { %v736_v17 = vmul.f32 %v2281_v16, %v2279_v15 }
 0x10f   : > { %v2285_v18 = vadd.f32 %v736_v17, %v688_v14 }
 0x111   : > { %v551_v25 = vpop.permute.xlu1 %550 }
 0x112   : > { %v569_v26 = vmul.f32 %v551_v25, %v2251_v52  ;;  %v570_v56 = vmul.f32 %v551_v25, %v2254_v53 }
 0x114   : > { %v633_v27 = vadd.f32 %v617_v19, %v569_v26  ;;  %v300_v19 = vld [vmem:[%s299_s23] sm:$0xff]  ;;  %v634_v21 = vadd.f32 %v618_v47, %v570_v56 }
 0x115   : > { %vm302_vm2 = vcmp.eq.f32.partialorder %v300_v19, 1.0 }
 0x116   : > { %v655_v30 = vpop.permute.xlu1 %654  ;;  %v2366_v42 = vsel %vm302_vm2, 1.0, %v1972_v0 }
 0x117   : > { %v677_v32 = vmul.f32 %v655_v30, %v2268_v3  ;;  %v678_v33 = vmul.f32 %v655_v30, %v2265_v62  ;;  %v715_v30 = vpop.permute.xlu0 %714  ;;  %vm1055_vm4 = vcmp.gt.f32.partialorder %v2366_v42, 0.0 }
 0x119   : > { %v2301_v34 = vadd.f32 %v677_v32, %v629_v28  ;;  %v2303_v35 = vadd.f32 %v678_v33, %v630_v29  ;;  %v670_v29 = vmul.f32 %v2296_v31, %v2265_v62  ;;  %v673_v32 = vmul.f32 %v2242_v49, %v2268_v3 }
 0x11a   : > { %v625_v33 = vadd.f32 %v609_v6, %v561_v8  ;;  %v740_v49 = vmul.f32 %v715_v30, %v2279_v15  ;;  %v690_v8 = vadd.f32 %v674_v48, %v626_v54 }
 0x11b   : > { %v711_v36 = vpop.permute.xlu1 %710  ;;  %v2372_v6 = vpop.permute.xlu0 %730 }
 0x11c   : > { %v689_v57 = vadd.f32 %v673_v32, %v625_v33  ;;  %v756_v32 = vadd.f32 %v740_v49, %v2276_v13 }
 0x120   : > { %v2316_v58 = vpop.permute.xlu1 %602 }
 0x121   : > { %v619_v59 = vmul.f32 %v2316_v58, %v2245_v50 }
 0x123   : > { %v635_v63 = vadd.f32 %v619_v59, %v571_v45  ;;  %v686_v59 = vadd.f32 %v670_v29, %v622_v24 }
 0x125   : > { %v659_v9 = vpop.permute.xlu1 %658  ;;  %v2335_v10 = vadd.f32 %v683_v60, %v635_v63  ;;  %v734_v63 = vmul.f32 %v2322_v61, %v2279_v15 }
 0x126   : > { %v679_v14 = vmul.f32 %v659_v9, %v2268_v3  ;;  %v680_v17 = vmul.f32 %v659_v9, %v2265_v62  ;;  %v738_v9 = vmul.f32 %v711_v36, %v2279_v15 }
 0x127   : > { %v750_v0 = vadd.f32 %v734_v63, %v686_v59 }
 0x128   : > { %v2343_v26 = vadd.f32 %v679_v14, %v631_v40  ;;  %v696_v28 = vadd.f32 %v680_v17, %v632_v2  ;;  %v737_v40 = vmul.f32 %v711_v36, %v2355_v55  ;;  %v739_v2 = vmul.f32 %v715_v30, %v2355_v55 }
 0x129   : > { %v663_v45 = vpop.permute.xlu1 %662  ;;  %v747_v36 = vmul.f32 %v2372_v6, %v2355_v55  ;;  %v2387_v56 = vadd.f32 %v738_v9, %v690_v8 }
 0x12a   : > { %v681_v41 = vmul.f32 %v663_v45, %v2268_v3  ;;  %v2378_v29 = vadd.f32 %v737_v40, %v689_v57  ;;  %v755_v30 = vadd.f32 %v739_v2, %v2274_v11  ;;  %v682_v33 = vmul.f32 %v663_v45, %v2265_v62 }
 0x12c   : > { %v2358_v60 = vadd.f32 %v681_v41, %v633_v27  ;;  %v900_v27 = vsub.s32 1, %v2184_v5  ;;  %v425_v14 = vpop.f32.mrb[0].mxu1 }
 0x12d   : > { %v766_v22 = vcombine.high %v425_v14, %v425_v14  ;;  %v773_v23 = vrot.slane %v425_v14, %v2190_v7  ;;  %v1687_v24 = vpop.f32.mrb[1].mxu1 }
 0x12e   : > { %v719_v25 = vpop.permute.xlu1 %718 }
 0x12f   : > { %v780_v41 = vrot.slane %v766_v22, %v2190_v7  ;;  %v781_v48 = vcombine.high %v773_v23, %v773_v23  ;;  %v789_v47 = vrot.slane %v773_v23, %v2190_v7  ;;  %v741_v59 = vmul.f32 %v719_v25, %v2355_v55 }
 0x130   : > { %v2392_v13 = vpop.f32.mrb[2].mxu1  ;;  %v742_v14 = vmul.f32 %v719_v25, %v2279_v15  ;;  %v698_v23 = vadd.f32 %v682_v33, %v634_v21 }
 0x131   : > { %v782_v57 = vcombine.high %v780_v41, %v780_v41  ;;  %v796_v40 = vrot.slane %v780_v41, %v2190_v7  ;;  %v803_v45 = vrot.slane %v781_v48, %v2190_v7  ;;  %v811_v2 = vcombine.high %v789_v47, %v789_v47  ;;  %v1690_v49 = vpop.f32.mrb[3].mxu1 }
 0x132   : > { %v723_v54 = vpop.permute.xlu1 %722  ;;  %v2398_v8 = vrot.slane %v789_v47, %v2201_v12  ;;  %v901_v22 = vrot.slane %v2392_v13, %v900_v27  ;;  %v763_v41 = vadd.f32 %v747_v36, %v2335_v10  ;;  %v757_v48 = vadd.f32 %v741_v59, %v2301_v34 }
 0x133   : > { %v743_v63 = vmul.f32 %v723_v54, %v2355_v55  ;;  %v744_v11 = vmul.f32 %v723_v54, %v2279_v15  ;;  %v810_v24 = vrot.slane %v782_v57, %v2190_v7  ;;  %v2403_v54 = vrot.slane %v803_v45, %v2201_v12 }
 0x134   : > { %v813_v1 = vcombine.high %v803_v45, %v803_v45  ;;  %v826_v49 = vrot.slane %v811_v2, %v2201_v12  ;;  %v856_v25 = vmul.f32 %v2369_v4, %v2398_v8  ;;  %903 = vbcast.lane.b32.xlu0 %v901_v22, 256  ;;  %v834_v10 = vrot.slane %v796_v40, %v2201_v12 }
 0x135   : > { %v760_v9 = vadd.f32 %v744_v11, %v696_v28  ;;  %v812_v28 = vcombine.high %v796_v40, %v796_v40  ;;  %v814_v47 = vcombine.high %v810_v24, %v810_v24  ;;  %v759_v27 = vadd.f32 %v743_v63, %v2343_v26 }
 0x136   : > { %v838_v21 = vrot.slane %v810_v24, %v2201_v12  ;;  %v727_v33 = vpop.permute.xlu1 %726  ;;  %v758_v11 = vadd.f32 %v742_v14, %v2303_v35  ;;  %v858_v34 = vmul.f32 %v2369_v4, %v2403_v54  ;;  %v859_v36 = vmul.f32 %v2366_v42, %v826_v49 }
 0x137   : > { %v860_v59 = vmul.f32 %v2369_v4, %v826_v49  ;;  %v2418_v57 = vadd.f32 %v856_v25, %v750_v0  ;;  %v830_v63 = vrot.slane %v813_v1, %v2201_v12  ;;  %v890_v35 = vrot.slane %v2392_v13, %v2201_v12 }
 0x138   : > { %v865_v45 = vmul.f32 %v2366_v42, %v838_v21  ;;  %v866_v26 = vmul.f32 %v2369_v4, %v838_v21  ;;  %v745_v40 = vmul.f32 %v727_v33, %v2355_v55  ;;  %v746_v2 = vmul.f32 %v727_v33, %v2279_v15 }
 0x139   : > { %v842_v0 = vrot.slane %v812_v28, %v2201_v12  ;;  %v2433_v49 = vrot.slane %v814_v47, %v2201_v12  ;;  %v861_v25 = vmul.f32 %v2366_v42, %v830_v63  ;;  %v862_v1 = vmul.f32 %v2369_v4, %v830_v63  ;;  %892 = vbcast.lane.b32.xlu1 %v890_v35, 256 }
 0x13a   : > { %v2427_v14 = vadd.f32 %v865_v45, %v759_v27  ;;  %v2429_v24 = vadd.f32 %v866_v26, %v760_v9  ;;  %v761_v21 = vadd.f32 %v745_v40, %v2358_v60  ;;  %v762_v19 = vadd.f32 %v746_v2, %v698_v23 }
 0x13b   : > { %v863_v17 = vmul.f32 %v2366_v42, %v834_v10  ;;  %v867_v27 = vmul.f32 %v2366_v42, %v842_v0  ;;  %v868_v9 = vmul.f32 %v2369_v4, %v842_v0  ;;  %v869_v28 = vmul.f32 %v2366_v42, %v2433_v49 }
 0x13c   : > { %v864_v47 = vmul.f32 %v2369_v4, %v834_v10  ;;  %v2444_v33 = vadd.f32 %v861_v25, %v755_v30  ;;  %v2446_v45 = vadd.f32 %v862_v1, %v756_v32  ;;  %v2904_v26 = vsub.s32 2, %v2184_v5 }
 0x13d   : > { %v2451_v23 = vadd.f32 %v867_v27, %v761_v21  ;;  %v2453_v63 = vadd.f32 %v868_v9, %v762_v19  ;;  %v2455_v40 = vadd.f32 %v869_v28, %v763_v41  ;;  %896 = vbcast.lane.b32.xlu1 %v890_v35, 264  ;;  %v933_v2 = vsub.s32 4, %v2184_v5 }
 0x13e   : > { %v912_v60 = vrot.slane %v2392_v13, %v2904_v26  ;;  %v2459_v10 = vadd.f32 %v858_v34, %v2285_v18  ;;  %v2462_v30 = vadd.f32 %v859_v36, %v2378_v29  ;;  %v2905_v32 = vsub.s32 3, %v2184_v5 }
 0x13f   : > { %v2468_v25 = vadd.f32 %v860_v59, %v2387_v56  ;;  %v2470_v19 = vadd.f32 %v863_v17, %v757_v48  ;;  %v2472_v41 = vadd.f32 %v864_v47, %v758_v11  ;;  %v934_v35 = vrot.slane %v2392_v13, %v933_v2  ;;  %v341_v48 = vld [vmem:[%s2889_s3] sm:$0xff] }
 0x140   : > { %914 = vbcast.lane.b32.xlu0 %v912_v60, 256  ;;  %v923_v0 = vrot.slane %v2392_v13, %v2905_v32  ;;  %v944_v18 = vsub.s32 5, %v2184_v5  ;;  %v955_v34 = vsub.s32 6, %v2184_v5  ;;  %v966_v17 = vsub.s32 7, %v2184_v5  ;;  %1683 = vmatmul.mubr.msk.f32.vlgmr.msra.gmra.mrb[0].mxu0 %vm344_vm1, %v341_v48 }
 0x141   : > { %907 = vbcast.lane.b32.xlu1 %v901_v22, 264  ;;  %v605_v26 = vmul.f32 %v2224_v37, %v2245_v50  ;;  %v557_v2 = vmul.f32 %v2236_v44, %v2251_v52  ;;  %v559_v32 = vmul.f32 %v2238_v46, %v2251_v52  ;;  %v671_v37 = vmul.f32 %v2234_v43, %v2268_v3 }
 0x142   : > { %v945_v29 = vrot.slane %v2392_v13, %v944_v18  ;;  %v956_v56 = vrot.slane %v2392_v13, %v955_v34  ;;  %v967_v22 = vrot.slane %v2392_v13, %v966_v17  ;;  %v684_v46 = vmul.f32 %v2305_v38, %v2265_v62 }
 0x143   : > { %v857_v62 = vmul.f32 %v2366_v42, %v2403_v54 }
 0x144   : > { %925 = vbcast.lane.b32.xlu0 %v923_v0, 256 }
 0x145   : > { %918 = vbcast.lane.b32.xlu1 %v912_v60, 264  ;;  %v607_v60 = vmul.f32 %v2226_v39, %v2245_v50  ;;  %v669_v39 = vmul.f32 %v2296_v31, %v2268_v3  ;;  %v748_v3 = vmul.f32 %v2372_v6, %v2279_v15 }
 0x147   : > { %v623_v34 = vadd.f32 %v607_v60, %v559_v32 }
 0x148   : > { %936 = vbcast.lane.b32.xlu0 %v934_v35, 256 }
 0x149   : > { %929 = vbcast.lane.b32.xlu1 %v923_v0, 264  ;;  %v620_v0 = vmul.f32 %v2316_v58, %v2248_v51  ;;  %v735_v51 = vmul.f32 %v2281_v16, %v2355_v55  ;;  %v687_v52 = vadd.f32 %v671_v37, %v623_v34  ;;  %v855_v16 = vmul.f32 %v2366_v42, %v2398_v8 }
 0x14c   : > { %947 = vbcast.lane.b32.xlu0 %v945_v29, 256 }
 0x14d   : > { %940 = vbcast.lane.b32.xlu1 %v934_v35, 264  ;;  %v572_v35 = vmul.f32 %v2289_v20, %v2254_v53  ;;  %v733_v20 = vmul.f32 %v2322_v61, %v2355_v55  ;;  %v870_v61 = vmul.f32 %v2369_v4, %v2433_v49 }
 0x14f   : > { %v636_v50 = vadd.f32 %v620_v0, %v572_v35 }
 0x150   : > { %958 = vbcast.lane.b32.xlu0 %v956_v56, 256 }
 0x151   : > { %951 = vbcast.lane.b32.xlu1 %v945_v29, 264  ;;  %v621_v29 = vadd.f32 %v605_v26, %v557_v2  ;;  %v700_v58 = vadd.f32 %v684_v46, %v636_v50 }
 0x153   : > { %v685_v53 = vadd.f32 %v669_v39, %v621_v29  ;;  %v764_v17 = vadd.f32 %v748_v3, %v700_v58 }
 0x154   : > { %969 = vbcast.lane.b32.xlu0 %v967_v22, 256 }
 0x155   : > { %962 = vbcast.lane.b32.xlu1 %v956_v56, 264  ;;  %v751_v56 = vadd.f32 %v735_v51, %v687_v52  ;;  %v749_v38 = vadd.f32 %v733_v20, %v685_v53  ;;  %v886_v32 = vadd.f32 %v870_v61, %v764_v17 }
 0x157   : > { %v871_v48 = vadd.f32 %v855_v16, %v749_v38  ;;  %v873_v6 = vadd.f32 %v857_v62, %v751_v56 }
 0x159   : > { %973 = vbcast.lane.b32.xlu1 %v967_v22, 264 }
 0x172   : > { %308 = vxpose.xlu0.b32.start [1/2] (short) (narrow) %v2366_v42, 16 }
 0x176   : > { %309 = vxpose.xlu0.b32.end [2/2] (short) (narrow) %v2369_v4, 16 }
 0x1a6   : > { %v904_v36 = vpop.permute.xlu0 %903 }
 0x1ab   : > { %v893_v11 = vpop.permute.xlu1 %892 }
 0x1af   : > { %v897_v59 = vpop.permute.xlu1 %896 }
 0x1b2   : > { %v915_v1 = vpop.permute.xlu0 %914 }
 0x1b3   : > { %v908_v21 = vpop.permute.xlu1 %907 }
 0x1b6   : > { %v2487_v13 = vpop.permute.xlu0 %925 }
 0x1b7   : > { %v2489_v27 = vpop.permute.xlu1 %918 }
 0x1ba   : > { %v2491_v9 = vpop.permute.xlu0 %936 }
 0x1bb   : > { %v2493_v28 = vpop.permute.xlu1 %929 }
 0x1be   : > { %v2495_v47 = vpop.permute.xlu0 %947 }
 0x1bf   : > { %v2509_v18 = vpop.permute.xlu1 %940 }
 0x1c2   : > { %v2515_v44 = vpop.permute.xlu0 %958 }
 0x1c3   : > { %v2523_v43 = vpop.permute.xlu1 %951 }
 0x1c6   : > { %v2527_v31 = vpop.permute.xlu0 %969 }
 0x1c7   : > { %v963_v55 = vpop.permute.xlu1 %962 }
 0x1cb   : > { %v974_v35 = vpop.permute.xlu1 %973 }
 0x1f2   : > { %v2535_v22 = vpop.trf.xlu0 }
 0x1f3   : > { %v975_v15 = vmul.f32 %v893_v11, %v2535_v22  ;;  %v977_v26 = vmul.f32 %v904_v36, %v2535_v22  ;;  %v979_v54 = vmul.f32 %v915_v1, %v2535_v22 }
 0x1f5   : > { %v991_v60 = vadd.f32 %v975_v15, %v871_v48  ;;  %v993_v2 = vadd.f32 %v977_v26, %v873_v6  ;;  %v995_v39 = vadd.f32 %v979_v54, %v2462_v30 }
 0x1f6   : > { %v2540_v0 = vpop.trf.xlu0 }
 0x1f7   : > { %vm1007_vm6 = vcmp.ge.f32.partialorder %v991_v60, 0.0  ;;  %v1023_v8 = vmul.f32 0.2, %v991_v60  ;;  %v976_v49 = vmul.f32 %v897_v59, %v2540_v0  ;;  %vm1009_vm7 = vcmp.ge.f32.partialorder %v993_v2, 0.0 }
 0x1f8   : > { %v1025_v11 = vmul.f32 0.2, %v993_v2  ;;  %v988_v36 = vmul.f32 %v963_v55, %v2540_v0  ;;  %v978_v37 = vmul.f32 %v908_v21, %v2540_v0  ;;  %v990_v34 = vmul.f32 %v974_v35, %v2540_v0 }
 0x1f9   : > { %v1039_v1 = vsel %vm1007_vm6, %v991_v60, %v1023_v8  ;;  %v992_v29 = vadd.f32 %v976_v49, %v2418_v57  ;;  %v981_v57 = vmul.f32 %v2487_v13, %v2535_v22  ;;  %vm1011_vm12 = vcmp.ge.f32.partialorder %v995_v39, 0.0 }
 0x1fa   : > { %v2552_v50 = vsel %vm1055_vm4, %v1039_v1, -9e+15  ;;  %v1041_v59 = vsel %vm1009_vm7, %v993_v2, %v1025_v11  ;;  %v1004_v46 = vadd.f32 %v988_v36, %v2453_v63  ;;  %v994_v51 = vadd.f32 %v978_v37, %v2459_v10 }
 0x1fb   : > { %v1078_v52 = vsel %vm1077_vm5, %v2552_v50, -inf  ;;  %vm1008_vm9 = vcmp.ge.f32.partialorder %v992_v29, 0.0  ;;  %v1024_v21 = vmul.f32 0.2, %v992_v29  ;;  %v2562_v30 = vsel %vm1055_vm4, %v1041_v59, -9e+15 }
 0x1fc   : > { %1079 = vmax.xlane.f32.xlu1 %v1078_v52  ;;  %vm1020_vm10 = vcmp.ge.f32.partialorder %v1004_v46, 0.0  ;;  %v1036_v53 = vmul.f32 0.2, %v1004_v46  ;;  %vm1010_vm11 = vcmp.ge.f32.partialorder %v994_v51, 0.0  ;;  %v1026_v63 = vmul.f32 0.2, %v994_v51 }
 0x1fd   : > { %v1040_v20 = vsel %vm1008_vm9, %v992_v29, %v1024_v21  ;;  %v1006_v58 = vadd.f32 %v990_v34, %v886_v32  ;;  %v1027_v10 = vmul.f32 0.2, %v995_v39  ;;  %v980_v13 = vmul.f32 %v2489_v27, %v2540_v0 }
 0x1fe   : > { %v2566_v3 = vsel %vm1056_vm8, %v1040_v20, -9e+15  ;;  %v1052_v56 = vsel %vm1020_vm10, %v1004_v46, %v1036_v53  ;;  %v1084_v38 = vsel %vm1077_vm5, %v2562_v30, -inf  ;;  %v1042_v16 = vsel %vm1010_vm11, %v994_v51, %v1026_v63 }
 0x1ff   : > { %v1081_v62 = vsel %vm1077_vm5, %v2566_v3, -inf  ;;  %vm1022_vm13 = vcmp.ge.f32.partialorder %v1006_v58, 0.0  ;;  %v2576_v17 = vsel %vm1056_vm8, %v1052_v56, -9e+15  ;;  %v2580_v61 = vsel %vm1056_vm8, %v1042_v16, -9e+15 }
 0x200   : > { %1082 = vmax.xlane.f32.xlu0 %v1081_v62  ;;  %1085 = vmax.xlane.f32.xlu1 %v1084_v38  ;;  %v1038_v55 = vmul.f32 0.2, %v1006_v58  ;;  %v1043_v27 = vsel %vm1011_vm12, %v995_v39, %v1027_v10  ;;  %v996_v48 = vadd.f32 %v980_v13, %v2468_v25  ;;  %v997_v15 = vadd.f32 %v981_v57, %v2444_v33 }
 0x201   : > { %v982_v26 = vmul.f32 %v2493_v28, %v2540_v0  ;;  %v1117_v60 = vsel %vm1077_vm5, %v2576_v17, -inf  ;;  %v1087_v2 = vsel %vm1077_vm5, %v2580_v61, -inf  ;;  %v2596_v33 = vsel %vm1055_vm4, %v1043_v27, -9e+15 }
 0x202   : > { %v1054_v6 = vsel %vm1022_vm13, %v1006_v58, %v1038_v55  ;;  %vm1012_vm14 = vcmp.ge.f32.partialorder %v996_v48, 0.0  ;;  %v1028_v54 = vmul.f32 0.2, %v996_v48  ;;  %v1029_v28 = vmul.f32 0.2, %v997_v15 }
 0x203   : > { %v2592_v32 = vsel %vm1056_vm8, %v1054_v6, -9e+15  ;;  %v998_v8 = vadd.f32 %v982_v26, %v2446_v45  ;;  %v983_v49 = vmul.f32 %v2491_v9, %v2535_v22  ;;  %vm1013_vm15 = vcmp.ge.f32.partialorder %v997_v15, 0.0 }
 0x204   : > { %1118 = vmax.xlane.f32.xlu0 %v1117_v60  ;;  %1088 = vmax.xlane.f32.xlu1 %v1087_v2  ;;  %v1044_v25 = vsel %vm1012_vm14, %v996_v48, %v1028_v54  ;;  %v1123_v35 = vsel %vm1077_vm5, %v2592_v32, -inf  ;;  %v1090_v11 = vsel %vm1077_vm5, %v2596_v33, -inf  ;;  %v1045_v37 = vsel %vm1013_vm15, %v997_v15, %v1029_v28 }
 0x205   : > { %v2607_v36 = vsel %vm1056_vm8, %v1044_v25, -9e+15  ;;  %v1030_v1 = vmul.f32 0.2, %v998_v8  ;;  %v999_v45 = vadd.f32 %v983_v49, %v2470_v19  ;;  %v984_v9 = vmul.f32 %v2509_v18, %v2540_v0 }
 0x206   : > { %vm1014_vm0 = vcmp.ge.f32.partialorder %v998_v8, 0.0  ;;  %v1093_v29 = vsel %vm1077_vm5, %v2607_v36, -inf  ;;  %v2616_v34 = vsel %vm1055_vm4, %v1045_v37, -9e+15  ;;  %v985_v51 = vmul.f32 %v2495_v47, %v2535_v22 }
 0x207   : > { %v1046_v39 = vsel %vm1014_vm0, %v998_v8, %v1030_v1  ;;  %v1031_v59 = vmul.f32 0.2, %v999_v45  ;;  %v1000_v46 = vadd.f32 %v984_v9, %v2472_v41  ;;  %vm1015_vm1 = vcmp.ge.f32.partialorder %v999_v45, 0.0 }
 0x208   : > { %1124 = vmax.xlane.f32.xlu0 %v1123_v35  ;;  %1091 = vmax.xlane.f32.xlu1 %v1090_v11  ;;  %v1096_v19 = vsel %vm1077_vm5, %v2616_v34, -inf  ;;  %v2625_v18 = vsel %vm1056_vm8, %v1046_v39, -9e+15  ;;  %v1001_v57 = vadd.f32 %v985_v51, %v2427_v14  ;;  %v986_v53 = vmul.f32 %v2523_v43, %v2540_v0 }
 0x209   : > { %v1047_v52 = vsel %vm1015_vm1, %v999_v45, %v1031_v59  ;;  %v1032_v21 = vmul.f32 0.2, %v1000_v46  ;;  %vm1016_vm2 = vcmp.ge.f32.partialorder %v1000_v46, 0.0  ;;  %v1099_v41 = vsel %vm1077_vm5, %v2625_v18, -inf }
 0x20a   : > { %v2634_v47 = vsel %vm1055_vm4, %v1047_v52, -9e+15  ;;  %v1033_v63 = vmul.f32 0.2, %v1001_v57  ;;  %v1002_v58 = vadd.f32 %v986_v53, %v2429_v24  ;;  %v987_v10 = vmul.f32 %v2515_v44, %v2535_v22 }
 0x20b   : > { %v1048_v20 = vsel %vm1016_vm2, %v1000_v46, %v1032_v21  ;;  %vm1017_vm3 = vcmp.ge.f32.partialorder %v1001_v57, 0.0  ;;  %v1102_v14 = vsel %vm1077_vm5, %v2634_v47, -inf  ;;  %v989_v62 = vmul.f32 %v2527_v31, %v2535_v22 }
 0x20c   : > { %1094 = vmax.xlane.f32.xlu1 %v1093_v29  ;;  %v2643_v43 = vsel %vm1056_vm8, %v1048_v20, -9e+15  ;;  %v1049_v0 = vsel %vm1017_vm3, %v1001_v57, %v1033_v63  ;;  %v1034_v56 = vmul.f32 0.2, %v1002_v58  ;;  %v1003_v13 = vadd.f32 %v987_v10, %v2451_v23 }
 0x20d   : > { %vm1018_vm6 = vcmp.ge.f32.partialorder %v1002_v58, 0.0  ;;  %v1105_v24 = vsel %vm1077_vm5, %v2643_v43, -inf  ;;  %v2652_v44 = vsel %vm1055_vm4, %v1049_v0, -9e+15  ;;  %v1005_v55 = vadd.f32 %v989_v62, %v2455_v40 }
 0x20e   : > { %v1050_v38 = vsel %vm1018_vm6, %v1002_v58, %v1034_v56  ;;  %v1035_v16 = vmul.f32 0.2, %v1003_v13  ;;  %vm1019_vm7 = vcmp.ge.f32.partialorder %v1003_v13, 0.0  ;;  %v1108_v23 = vsel %vm1077_vm5, %v2652_v44, -inf }
 0x20f   : > { %v2659_v31 = vsel %vm1056_vm8, %v1050_v38, -9e+15  ;;  %v1037_v27 = vmul.f32 0.2, %v1005_v55  ;;  %vm1021_vm9 = vcmp.ge.f32.partialorder %v1005_v55, 0.0  ;;  %vm1516_vm8 = vcmask 1041409  }
 0x210   : > { %1097 = vmax.xlane.f32.xlu1 %v1096_v19  ;;  %v1051_v22 = vsel %vm1019_vm7, %v1003_v13, %v1035_v16  ;;  %v1111_v48 = vsel %vm1077_vm5, %v2659_v31, -inf  ;;  %vm1518_vm10 = vcmask 1042434   ;;  %vm1520_vm11 = vcmask 1043459  }
 0x211   : > { %v2665_v15 = vsel %vm1055_vm4, %v1051_v22, -9e+15  ;;  %v1053_v40 = vsel %vm1021_vm9, %v1005_v55, %v1037_v27  ;;  %vm1522_vm12 = vcmask 1044484   ;;  %vm1524_vm13 = vcmask 1045509  }
 0x212   : > { %v1114_v6 = vsel %vm1077_vm5, %v2665_v15, -inf  ;;  %v2671_v26 = vsel %vm1055_vm4, %v1053_v40, -9e+15  ;;  %vm1451_vm4 = vcmask 130112   ;;  %vm1526_vm14 = vcmask 1046534  }
 0x213   : > { %v1120_v60 = vsel %vm1077_vm5, %v2671_v26, -inf  ;;  %vm1528_vm15 = vcmask 1047559  }
 0x214   : > { %1100 = vmax.xlane.f32.xlu1 %v1099_v41 }
 0x218   : > { %1103 = vmax.xlane.f32.xlu1 %v1102_v14 }
 0x21c   : > { %1106 = vmax.xlane.f32.xlu1 %v1105_v24 }
 0x220   : > { %1109 = vmax.xlane.f32.xlu1 %v1108_v23 }
 0x224   : > { %1112 = vmax.xlane.f32.xlu1 %v1111_v48 }
 0x228   : > { %1115 = vmax.xlane.f32.xlu1 %v1114_v6 }
 0x22c   : > { %1121 = vmax.xlane.f32.xlu1 %v1120_v60 }
 0x289   : > { %v1080_v2 = vpop.xlane.xlu1 %1079 }
 0x28a   : > { %v1126_v54 = vsub.f32 %v2552_v50, %v1080_v2  ;;  %v2719_v2 = vpop.f32.mrb[0].mxu0 }
 0x28c   : > { %v1142_v25 = vmul.f32 1.442695, %v1126_v54 }
 0x28d   : > { %v1083_v28 = vpop.xlane.xlu0 %1082  ;;  %v1086_v8 = vpop.xlane.xlu1 %1085 }
 0x28e   : > { %1772 = vpow2.f32 %v1142_v25  ;;  %v1127_v49 = vsub.f32 %v2566_v3, %v1083_v28  ;;  %v1128_v35 = vsub.f32 %v2562_v30, %v1086_v8  ;;  %v1684_v25 = vpop.f32.mrb[1].mxu0 }
 0x290   : > { %v1144_v11 = vmul.f32 1.442695, %v1127_v49  ;;  %v1146_v37 = vmul.f32 1.442695, %v1128_v35 }
 0x291   : > { %v1089_v1 = vpop.xlane.xlu1 %1088  ;;  %v1119_v24 = vpop.xlane.xlu0 %1118 }
 0x292   : > { %1774 = vpow2.f32 %v1144_v11  ;;  %v1129_v45 = vsub.f32 %v2580_v61, %v1089_v1  ;;  %v1139_v48 = vsub.f32 %v2576_v17, %v1119_v24 }
 0x293   : > { %1776 = vpow2.f32 %v1146_v37 }
 0x294   : > { %v1148_v9 = vmul.f32 1.442695, %v1129_v45 }
 0x295   : > { %v1092_v29 = vpop.xlane.xlu1 %1091  ;;  %v1125_v40 = vpop.xlane.xlu0 %1124 }
 0x296   : > { %v1130_v39 = vsub.f32 %v2596_v33, %v1092_v29  ;;  %1778 = vpow2.f32 %v1148_v9  ;;  %v1141_v8 = vsub.f32 %v2592_v32, %v1125_v40 }
 0x298   : > { %v2680_v50 = vpop.eup %1772  ;;  %v1150_v59 = vmul.f32 1.442695, %v1130_v39 }
 0x299   : > { %v1095_v46 = vpop.xlane.xlu1 %1094  ;;  %v1174_v3 = vsel %vm1077_vm5, %v2680_v50, 0.0 }
 0x29a   : > { %v1131_v30 = vsub.f32 %v2607_v36, %v1095_v46  ;;  %1175 = vadd.xlane.f32.xlu1 %v1174_v3  ;;  %1780 = vpow2.f32 %v1150_v59 }
 0x29c   : > { %v2685_v51 = vpop.eup %1774  ;;  %v1152_v61 = vmul.f32 1.442695, %v1131_v30 }
 0x29d   : > { %v2687_v19 = vpop.eup %1776  ;;  %v1098_v52 = vpop.xlane.xlu1 %1097  ;;  %v1177_v33 = vsel %vm1077_vm5, %v2685_v51, 0.0 }
 0x29e   : > { %1782 = vpow2.f32 %v1152_v61  ;;  %v1132_v21 = vsub.f32 %v2616_v34, %v1098_v52  ;;  %1178 = vadd.xlane.f32.xlu0 %v1177_v33  ;;  %v1180_v57 = vsel %vm1077_vm5, %v2687_v19, 0.0 }
 0x29f   : > { %1181 = vadd.xlane.f32.xlu1 %v1180_v57 }
 0x2a0   : > { %v1154_v36 = vmul.f32 1.442695, %v1132_v21  ;;  %v2694_v53 = vpop.eup %1778 }
 0x2a1   : > { %v1101_v41 = vpop.xlane.xlu1 %1100  ;;  %v1183_v63 = vsel %vm1077_vm5, %v2694_v53, 0.0 }
 0x2a2   : > { %1784 = vpow2.f32 %v1154_v36  ;;  %v1133_v20 = vsub.f32 %v2625_v18, %v1101_v41  ;;  %1184 = vadd.xlane.f32.xlu0 %v1183_v63 }
 0x2a4   : > { %v1156_v58 = vmul.f32 1.442695, %v1133_v20  ;;  %v2699_v10 = vpop.eup %1780  ;;  %v1278_v20 = vrot.slane %v2719_v2, %v2190_v7 }
 0x2a5   : > { %v1104_v34 = vpop.xlane.xlu1 %1103  ;;  %v1186_v0 = vsel %vm1077_vm5, %v2699_v10, 0.0 }
 0x2a6   : > { %1786 = vpow2.f32 %v1156_v58  ;;  %v1134_v14 = vsub.f32 %v2634_v47, %v1104_v34  ;;  %1187 = vadd.xlane.f32.xlu1 %v1186_v0  ;;  %v1294_v58 = vrot.slane %v1278_v20, %v2190_v7 }
 0x2a8   : > { %v2704_v56 = vpop.eup %1782  ;;  %v1158_v13 = vmul.f32 1.442695, %v1134_v14  ;;  %v1286_v14 = vcombine.high %v1278_v20, %v1278_v20 }
 0x2a9   : > { %v1107_v62 = vpop.xlane.xlu1 %1106  ;;  %v1189_v18 = vsel %vm1077_vm5, %v2704_v56, 0.0 }
 0x2aa   : > { %1788 = vpow2.f32 %v1158_v13  ;;  %v1135_v38 = vsub.f32 %v2643_v43, %v1107_v62  ;;  %1190 = vadd.xlane.f32.xlu0 %v1189_v18  ;;  %v1323_v62 = vrot.slane %v1294_v58, %v2201_v12  ;;  %v1308_v18 = vrot.slane %v1286_v14, %v2190_v7 }
 0x2ac   : > { %v2709_v16 = vpop.eup %1784  ;;  %v1160_v55 = vmul.f32 1.442695, %v1135_v38 }
 0x2ad   : > { %v1110_v47 = vpop.xlane.xlu1 %1109  ;;  %v1192_v23 = vsel %vm1077_vm5, %v2709_v16, 0.0 }
 0x2ae   : > { %1790 = vpow2.f32 %v1160_v55  ;;  %v1136_v22 = vsub.f32 %v2652_v44, %v1110_v47  ;;  %1193 = vadd.xlane.f32.xlu1 %v1192_v23  ;;  %v1168_v44 = vmul.f32 1.442695, %v1139_v48 }
 0x2b0   : > { %v2714_v27 = vpop.eup %1786  ;;  %v1162_v6 = vmul.f32 1.442695, %v1136_v22 }
 0x2b1   : > { %v1113_v60 = vpop.xlane.xlu1 %1112  ;;  %v1195_v43 = vsel %vm1077_vm5, %v2714_v27, 0.0 }
 0x2b2   : > { %1792 = vpow2.f32 %v1162_v6  ;;  %v1137_v54 = vsub.f32 %v2659_v31, %v1113_v60  ;;  %1196 = vadd.xlane.f32.xlu0 %v1195_v43  ;;  %v1172_v31 = vmul.f32 1.442695, %v1141_v8  ;;  %v1327_v6 = vrot.slane %v1308_v18, %v2201_v12 }
 0x2b3   : > { %v1316_v8 = vcombine.high %v1294_v58, %v1294_v58 }
 0x2b4   : > { %v2722_v28 = vpop.eup %1788  ;;  %v1164_v49 = vmul.f32 1.442695, %v1137_v54 }
 0x2b5   : > { %v1116_v17 = vpop.xlane.xlu1 %1115  ;;  %v1198_v35 = vsel %vm1077_vm5, %v2722_v28, 0.0 }
 0x2b6   : > { %1794 = vpow2.f32 %v1164_v49  ;;  %v1138_v11 = vsub.f32 %v2665_v15, %v1116_v17  ;;  %1199 = vadd.xlane.f32.xlu1 %v1198_v35 }
 0x2b7   : > { %1796 = vpow2.f32 %v1168_v44 }
 0x2b8   : > { %v2728_v37 = vpop.eup %1790  ;;  %v1166_v1 = vmul.f32 1.442695, %v1138_v11 }
 0x2b9   : > { %v1122_v45 = vpop.xlane.xlu1 %1121  ;;  %v1201_v9 = vsel %vm1077_vm5, %v2728_v37, 0.0 }
 0x2ba   : > { %1798 = vpow2.f32 %v1166_v1  ;;  %v1140_v32 = vsub.f32 %v2671_v26, %v1122_v45  ;;  %1202 = vadd.xlane.f32.xlu0 %v1201_v9  ;;  %v1331_v9 = vrot.slane %v1316_v8, %v2201_v12 }
 0x2bb   : > { %1800 = vpow2.f32 %v1172_v31 }
 0x2bc   : > { %v2733_v29 = vpop.eup %1792  ;;  %v1170_v39 = vmul.f32 1.442695, %v1140_v32 }
 0x2bd   : > { %v1204_v15 = vsel %vm1077_vm5, %v2733_v29, 0.0 }
 0x2be   : > { %1802 = vpow2.f32 %v1170_v39  ;;  %1205 = vadd.xlane.f32.xlu1 %v1204_v15 }
 0x2c0   : > { %v2737_v59 = vpop.eup %1794 }
 0x2c1   : > { %v1207_v46 = vsel %vm1077_vm5, %v2737_v59, 0.0  ;;  %v2741_v3 = vpop.eup %1796 }
 0x2c2   : > { %1208 = vadd.xlane.f32.xlu0 %v1207_v46  ;;  %v1213_v26 = vsel %vm1077_vm5, %v2741_v3, 0.0 }
 0x2c4   : > { %v2743_v30 = vpop.eup %1798 }
 0x2c5   : > { %v1210_v61 = vsel %vm1077_vm5, %v2743_v30, 0.0  ;;  %v2749_v52 = vpop.eup %1800 }
 0x2c6   : > { %1214 = vadd.xlane.f32.xlu0 %v1213_v26  ;;  %1211 = vadd.xlane.f32.xlu1 %v1210_v61  ;;  %v1219_v21 = vsel %vm1077_vm5, %v2749_v52, 0.0  ;;  %v1318_v26 = vcombine.high %v1308_v18, %v1308_v18 }
 0x2c8   : > { %v2751_v33 = vpop.eup %1802  ;;  %v1335_v58 = vrot.slane %v1318_v26, %v2201_v12 }
 0x2c9   : > { %v1216_v57 = vsel %vm1077_vm5, %v2751_v33, 0.0 }
 0x2ca   : > { %1220 = vadd.xlane.f32.xlu0 %v1219_v21  ;;  %1217 = vadd.xlane.f32.xlu1 %v1216_v57  ;;  %v1271_v21 = vcombine.high %v2719_v2, %v2719_v2 }
 0x327   : > { %v1176_v36 = vpop.xlane.xlu1 %1175 }
 0x328   : > { %1804 = vrcp.f32 %v1176_v36 }
 0x32b   : > { %v1179_v41 = vpop.xlane.xlu0 %1178 }
 0x32c   : > { %1806 = vrcp.f32 %v1179_v41  ;;  %v1182_v63 = vpop.xlane.xlu1 %1181 }
 0x32d   : > { %1808 = vrcp.f32 %v1182_v63 }
 0x32f   : > { %v1185_v34 = vpop.xlane.xlu0 %1184 }
 0x330   : > { %1810 = vrcp.f32 %v1185_v34 }
 0x332   : > { %v1805_v0 = vpop.eup %1804 }
 0x333   : > { %v1238_v13 = vmul.f32 %v1805_v0, %v2680_v50  ;;  %v1188_v24 = vpop.xlane.xlu1 %1187 }
 0x334   : > { %1812 = vrcp.f32 %v1188_v24 }
 0x335   : > { %v1254_v38 = vmul.f32 %v2366_v42, %v1238_v13 }
 0x336   : > { %v1807_v55 = vpop.eup %1806 }
 0x337   : > { %v1809_v47 = vpop.eup %1808  ;;  %v1191_v23 = vpop.xlane.xlu0 %1190  ;;  %v1360_v22 = vmul.f32 %v1323_v62, %v1254_v38  ;;  %v1239_v48 = vmul.f32 %v1807_v55, %v2685_v51 }
 0x338   : > { %1814 = vrcp.f32 %v1191_v23  ;;  %v1240_v40 = vmul.f32 %v1809_v47, %v2687_v19 }
 0x339   : > { %v1376_v50 = vsel %vm1077_vm5, %v1360_v22, 0.0  ;;  %v1255_v60 = vmul.f32 %v2369_v4, %v1239_v48 }
 0x33a   : > { %1377 = vadd.xlane.f32.xlu1 %v1376_v50  ;;  %v1256_v43 = vmul.f32 %v2366_v42, %v1240_v40  ;;  %v1811_v54 = vpop.eup %1810 }
 0x33b   : > { %v1194_v25 = vpop.xlane.xlu1 %1193  ;;  %v1361_v44 = vmul.f32 %v1323_v62, %v1255_v60  ;;  %v1241_v51 = vmul.f32 %v1811_v54, %v2694_v53 }
 0x33c   : > { %1816 = vrcp.f32 %v1194_v25  ;;  %v1362_v49 = vmul.f32 %v1327_v6, %v1256_v43 }
 0x33d   : > { %v1379_v17 = vsel %vm1077_vm5, %v1361_v44, 0.0  ;;  %v1257_v35 = vmul.f32 %v2369_v4, %v1241_v51 }
 0x33e   : > { %1380 = vadd.xlane.f32.xlu0 %v1379_v17  ;;  %v1382_v19 = vsel %vm1077_vm5, %v1362_v49, 0.0  ;;  %v1813_v11 = vpop.eup %1812 }
 0x33f   : > { %1383 = vadd.xlane.f32.xlu1 %v1382_v19  ;;  %v1197_v31 = vpop.xlane.xlu0 %1196  ;;  %v1363_v1 = vmul.f32 %v1327_v6, %v1257_v35  ;;  %v1242_v45 = vmul.f32 %v1813_v11, %v2699_v10 }
 0x340   : > { %1818 = vrcp.f32 %v1197_v31 }
 0x341   : > { %v1385_v39 = vsel %vm1077_vm5, %v1363_v1, 0.0  ;;  %v1258_v53 = vmul.f32 %v2366_v42, %v1242_v45 }
 0x342   : > { %v1815_v32 = vpop.eup %1814  ;;  %1386 = vadd.xlane.f32.xlu0 %v1385_v39 }
 0x343   : > { %v1200_v15 = vpop.xlane.xlu1 %1199  ;;  %v1243_v46 = vmul.f32 %v1815_v32, %v2704_v56  ;;  %v1364_v61 = vmul.f32 %v1331_v9, %v1258_v53  ;;  %v1285_v56 = vrot.slane %v1271_v21, %v2190_v7 }
 0x344   : > { %1820 = vrcp.f32 %v1200_v15 }
 0x345   : > { %v1259_v57 = vmul.f32 %v2369_v4, %v1243_v46  ;;  %v1388_v36 = vsel %vm1077_vm5, %v1364_v61, 0.0  ;;  %v1301_v18 = vrot.slane %v1285_v56, %v2190_v7  ;;  %v1287_v22 = vcombine.high %v1285_v56, %v1285_v56 }
 0x346   : > { %v1817_v10 = vpop.eup %1816  ;;  %1389 = vadd.xlane.f32.xlu1 %v1388_v36 }
 0x347   : > { %v1203_v41 = vpop.xlane.xlu0 %1202  ;;  %v1365_v20 = vmul.f32 %v1331_v9, %v1259_v57  ;;  %v1244_v63 = vmul.f32 %v1817_v10, %v2709_v16  ;;  %v1315_v44 = vrot.slane %v1287_v22, %v2190_v7  ;;  %v1317_v32 = vcombine.high %v1301_v18, %v1301_v18 }
 0x348   : > { %1822 = vrcp.f32 %v1203_v41 }
 0x349   : > { %v1391_v34 = vsel %vm1077_vm5, %v1365_v20, 0.0  ;;  %v1260_v14 = vmul.f32 %v2366_v42, %v1244_v63  ;;  %v1343_v11 = vrot.slane %v1315_v44, %v2201_v12  ;;  %v1347_v21 = vrot.slane %v1317_v32, %v2201_v12 }
 0x34a   : > { %v1819_v2 = vpop.eup %1818  ;;  %1392 = vadd.xlane.f32.xlu0 %v1391_v34 }
 0x34b   : > { %v1206_v0 = vpop.xlane.xlu1 %1205  ;;  %v1366_v13 = vmul.f32 %v1335_v58, %v1260_v14  ;;  %v1245_v62 = vmul.f32 %v1819_v2, %v2714_v27  ;;  %v1339_v27 = vrot.slane %v1301_v18, %v2201_v12 }
 0x34c   : > { %1824 = vrcp.f32 %v1206_v0 }
 0x34d   : > { %v1394_v16 = vsel %vm1077_vm5, %v1366_v13, 0.0  ;;  %v1261_v24 = vmul.f32 %v2369_v4, %v1245_v62 }
 0x34e   : > { %v1821_v38 = vpop.eup %1820  ;;  %1395 = vadd.xlane.f32.xlu1 %v1394_v16 }
 0x34f   : > { %v1209_v55 = vpop.xlane.xlu0 %1208  ;;  %v1367_v47 = vmul.f32 %v1335_v58, %v1261_v24  ;;  %v1246_v23 = vmul.f32 %v1821_v38, %v2722_v28  ;;  %v2906_v24 = vlaneseq }
 0x350   : > { %1826 = vrcp.f32 %v1209_v55 }
 0x351   : > { %v1397_v48 = vsel %vm1077_vm5, %v1367_v47, 0.0  ;;  %v1262_v40 = vmul.f32 %v2366_v42, %v1246_v23  ;;  %v1441_v38 = vand.u32 127, %v2906_v24 }
 0x352   : > { %v1823_v6 = vpop.eup %1822  ;;  %1398 = vadd.xlane.f32.xlu0 %v1397_v48 }
 0x353   : > { %v1215_v50 = vpop.xlane.xlu0 %1214  ;;  %v1212_v60 = vpop.xlane.xlu1 %1211  ;;  %v1368_v43 = vmul.f32 %v1339_v27, %v1262_v40  ;;  %v1247_v54 = vmul.f32 %v1823_v6, %v2728_v37  ;;  %v1444_v40 = vsub.s32 %v1441_v38, %v2184_v5 }
 0x354   : > { %1828 = vrcp.f32 %v1215_v50 }
 0x355   : > { %1830 = vrcp.f32 %v1212_v60  ;;  %v1400_v25 = vsel %vm1077_vm5, %v1368_v43, 0.0  ;;  %v1263_v28 = vmul.f32 %v2369_v4, %v1247_v54 }
 0x356   : > { %v1825_v8 = vpop.eup %1824  ;;  %1401 = vadd.xlane.f32.xlu1 %v1400_v25 }
 0x357   : > { %v1221_v49 = vpop.xlane.xlu0 %1220  ;;  %v1218_v51 = vpop.xlane.xlu1 %1217  ;;  %v1369_v17 = vmul.f32 %v1339_v27, %v1263_v28  ;;  %v1248_v19 = vmul.f32 %v1825_v8, %v2733_v29 }
 0x358   : > { %1832 = vrcp.f32 %v1221_v49 }
 0x359   : > { %1834 = vrcp.f32 %v1218_v51  ;;  %v1403_v35 = vsel %vm1077_vm5, %v1369_v17, 0.0  ;;  %v1264_v37 = vmul.f32 %v2366_v42, %v1248_v19 }
 0x35a   : > { %v1827_v31 = vpop.eup %1826  ;;  %1404 = vadd.xlane.f32.xlu0 %v1403_v35 }
 0x35b   : > { %v1370_v1 = vmul.f32 %v1343_v11, %v1264_v37  ;;  %v1249_v7 = vmul.f32 %v1827_v31, %v2737_v59  ;;  %v1319_v59 = vcombine.high %v1315_v44, %v1315_v44 }
 0x35d   : > { %v1406_v45 = vsel %vm1077_vm5, %v1370_v1, 0.0  ;;  %v1265_v9 = vmul.f32 %v2369_v4, %v1249_v7  ;;  %v1351_v56 = vrot.slane %v1319_v59, %v2201_v12 }
 0x35e   : > { %v1829_v39 = vpop.eup %1828  ;;  %1407 = vadd.xlane.f32.xlu1 %v1406_v45 }
 0x35f   : > { %v1831_v29 = vpop.eup %1830  ;;  %v1371_v53 = vmul.f32 %v1343_v11, %v1265_v9  ;;  %v1251_v15 = vmul.f32 %v1829_v39, %v2741_v3 }
 0x360   : > { %v1250_v46 = vmul.f32 %v1831_v29, %v2743_v30 }
 0x361   : > { %v1409_v26 = vsel %vm1077_vm5, %v1371_v53, 0.0  ;;  %v1267_v61 = vmul.f32 %v2369_v4, %v1251_v15 }
 0x362   : > { %v1833_v57 = vpop.eup %1832  ;;  %1410 = vadd.xlane.f32.xlu0 %v1409_v26  ;;  %v1266_v10 = vmul.f32 %v2366_v42, %v1250_v46 }
 0x363   : > { %v1835_v36 = vpop.eup %1834  ;;  %v1373_v41 = vmul.f32 %v1347_v21, %v1267_v61  ;;  %v1253_v20 = vmul.f32 %v1833_v57, %v2749_v52 }
 0x364   : > { %v1372_v63 = vmul.f32 %v1347_v21, %v1266_v10  ;;  %v1252_v3 = vmul.f32 %v1835_v36, %v2751_v33 }
 0x365   : > { %v1415_v30 = vsel %vm1077_vm5, %v1373_v41, 0.0  ;;  %v1269_v58 = vmul.f32 %v2369_v4, %v1253_v20 }
 0x366   : > { %1416 = vadd.xlane.f32.xlu0 %v1415_v30  ;;  %v1412_v34 = vsel %vm1077_vm5, %v1372_v63, 0.0  ;;  %v1268_v14 = vmul.f32 %v2366_v42, %v1252_v3  ;;  %v1446_v42 = vadd.s32 4294967288, %v1441_v38 }
 0x367   : > { %1413 = vadd.xlane.f32.xlu1 %v1412_v34  ;;  %v1375_v2 = vmul.f32 %v1351_v56, %v1269_v58 }
 0x368   : > { %v1374_v0 = vmul.f32 %v1351_v56, %v1268_v14  ;;  %v1449_v48 = vsub.s32 %v1446_v42, %v2184_v5 }
 0x369   : > { %v1421_v13 = vsel %vm1077_vm5, %v1375_v2, 0.0 }
 0x36a   : > { %1422 = vadd.xlane.f32.xlu0 %v1421_v13  ;;  %v1418_v52 = vsel %vm1077_vm5, %v1374_v0, 0.0 }
 0x36b   : > { %1419 = vadd.xlane.f32.xlu1 %v1418_v52 }
 0x3c7   : > { %v1378_v62 = vpop.xlane.xlu1 %1377 }
 0x3c8   : > { %v1445_v8 = vrot.slane %v1378_v62, %v1444_v40 }
 0x3cb   : > { %v1381_v33 = vpop.xlane.xlu0 %1380 }
 0x3cc   : > { %v1384_v4 = vpop.xlane.xlu1 %1383  ;;  %v1450_v43 = vrot.slane %v1381_v33, %v1449_v48 }
 0x3cd   : > { %v1456_v54 = vrot.slane %v1384_v4, %v1444_v40 }
 0x3ce   : > { %v1452_v31 = vsel %vm1451_vm4, %v1450_v43, %v1445_v8 }
 0x3cf   : > { %v1387_v18 = vpop.xlane.xlu0 %1386 }
 0x3d0   : > { %v1460_v27 = vrot.slane %v1387_v18, %v1449_v48 }
 0x3d2   : > { %v1461_v49 = vsel %vm1451_vm4, %v1460_v27, %v1456_v54 }
 0x3d3   : > { %v1390_v12 = vpop.xlane.xlu1 %1389  ;;  %v1517_v9 = vsel %vm1516_vm8, %v1461_v49, %v1452_v31 }
 0x3d4   : > { %v1465_v28 = vrot.slane %v1390_v12, %v1444_v40 }
 0x3d7   : > { %v1393_v16 = vpop.xlane.xlu0 %1392 }
 0x3d8   : > { %v1469_v50 = vrot.slane %v1393_v16, %v1449_v48 }
 0x3da   : > { %v1470_v5 = vsel %vm1451_vm4, %v1469_v50, %v1465_v28 }
 0x3db   : > { %v1396_v47 = vpop.xlane.xlu1 %1395  ;;  %v1519_v39 = vsel %vm1518_vm10, %v1470_v5, %v1517_v9 }
 0x3dc   : > { %v1474_v51 = vrot.slane %v1396_v47, %v1444_v40 }
 0x3df   : > { %v1399_v55 = vpop.xlane.xlu0 %1398 }
 0x3e0   : > { %v1478_v25 = vrot.slane %v1399_v55, %v1449_v48 }
 0x3e2   : > { %v1479_v1 = vsel %vm1451_vm4, %v1478_v25, %v1474_v51 }
 0x3e3   : > { %v1402_v22 = vpop.xlane.xlu1 %1401  ;;  %v1521_v15 = vsel %vm1520_vm11, %v1479_v1, %v1519_v39 }
 0x3e4   : > { %v1483_v35 = vrot.slane %v1402_v22, %v1444_v40 }
 0x3e7   : > { %v1405_v23 = vpop.xlane.xlu0 %1404 }
 0x3e8   : > { %v1487_v44 = vrot.slane %v1405_v23, %v1449_v48 }
 0x3ea   : > { %v1488_v32 = vsel %vm1451_vm4, %v1487_v44, %v1483_v35 }
 0x3eb   : > { %v1408_v60 = vpop.xlane.xlu1 %1407  ;;  %v1523_v21 = vsel %vm1522_vm12, %v1488_v32, %v1521_v15 }
 0x3ec   : > { %v1492_v7 = vrot.slane %v1408_v60, %v1444_v40 }
 0x3ef   : > { %v1411_v6 = vpop.xlane.xlu0 %1410 }
 0x3f0   : > { %v1496_v17 = vrot.slane %v1411_v6, %v1449_v48 }
 0x3f2   : > { %v1497_v29 = vsel %vm1451_vm4, %v1496_v17, %v1492_v7 }
 0x3f3   : > { %v1417_v19 = vpop.xlane.xlu0 %1416  ;;  %v1525_v57 = vsel %vm1524_vm13, %v1497_v29, %v1523_v21 }
 0x3f4   : > { %v1505_v37 = vrot.slane %v1417_v19, %v1449_v48  ;;  %v1414_v11 = vpop.xlane.xlu1 %1413 }
 0x3f5   : > { %v1501_v45 = vrot.slane %v1414_v11, %v1444_v40 }
 0x3f7   : > { %v1423_v53 = vpop.xlane.xlu0 %1422  ;;  %v1506_v46 = vsel %vm1451_vm4, %v1505_v37, %v1501_v45 }
 0x3f8   : > { %v1514_v26 = vrot.slane %v1423_v53, %v1449_v48  ;;  %v1420_v61 = vpop.xlane.xlu1 %1419  ;;  %v1527_v10 = vsel %vm1526_vm14, %v1506_v46, %v1525_v57 }
 0x3f9   : > { %v1510_v59 = vrot.slane %v1420_v61, %v1444_v40 }
 0x3fb   : > { %v1515_v36 = vsel %vm1451_vm4, %v1514_v26, %v1510_v59 }
 0x3fc   : > { %v1529_v41 = vsel %vm1528_vm15, %v1515_v36, %v1527_v10 }
 0x3fd   : > { %1531 = vst.msk [vmem:[%s294_s29] sm:$0xff] %vm1077_vm5, %v1529_v41 }
 0x3fe   : > { %1909 = shalt.err (!%p1906_p11)
}
 0x3ff   : > { %s1910_s13 = scalar_lea.hbm %s2841_s28, 128  ;;  %s1914_s23 = scalar_lea.hbm %s2891_s5, 256 }
 0x400   : > { %p1911_p12 = scmp.ne.s32.totalorder %s2841_s28, %s1910_s13  ;;  %p1915_p5 = scmp.lt.u32.totalorder %s2841_s28, %s2891_s5 }
 0x401   : > { %p1916_p6 = scmp.lt.u32.totalorder %s1914_s23, %s1910_s13  ;;  %p1918_p3 = scmp.lt.u32.totalorder %s1910_s13, %s2841_s28 }
 0x402   : > { %p1912_p2 = pnand %p1911_p12, %p2907_p7 }
 0x403   : > { %p1917_p13 = por %p1916_p6, %p1915_p5 }
 0x404   : > { %p1913_p4 = pneg %p1912_p2 }
 0x405   : > { %p1919_p10 = por %p1918_p3, %p1917_p13 }
 0x407   : > { %p1920_p8 = pnand %p1919_p10, %p1913_p4 }
 0x409   : > { %1923 = shalt.err (!%p1920_p8)
}
 0x40a   : > { %1697 = dma.vmem_to_hbm [thread:$0]  (%p2907_p7), %s2843_s8, 128, %s2841_s28, %s1533_s22  }
 0x40b PF: > { %s1558_s17 = sand.u32 1, %s1954_s18   ;;  %p2908_p9 = scmp.ne.s32.totalorder %s2898_s6, 0 }
 0x40c   : > { %p2909_p0 = scmp.ge.s32.totalorder %s1966_s21, 2  ;;  %s1559_s29 = scalar_lea.sflag [#allocation4], %s1558_s17 }
 0x40e   : > { %p1707_p1 = pnand %p2909_p0, %p2908_p9 }
 0x410   : > { %1949 = dma.done.wait (!%p1707_p1), %s1559_s29, 128  }
 0x411   : > { %1951 = vsyncadd (!%p1707_p1), %s1559_s29, 4294967168  ;;  %p21_p11 = scmp.ge.s32.totalorder %s2035_s24, 4   ;;  %s2910_s18 = smov %s1958_s19 }
 0x412   : > { %s2911_s19 = smov %s1962_s20  ;;  %s2912_s20 = smov %s2047_s27 }
 0x413   : > { %s2913_s21 = smov %s2035_s24  ;;  %23 = sbr.rel (!%p21_p11) target bundleno = 7 (0x7), region = 101 }
 0x41a   :  { %1564 = vsyncpa [#allocation3], 1 }
 0x41b   :  { %1566 = vsyncpa [#allocation3 + $0x1], 1 }
 0x41c   :  { %1567 = vsyncpa [#allocation6], 1 }
 0x41d   :  { %1569 = vsyncpa [#allocation6 + $0x1], 1 }
 0x41e   :  { %1570 = vsyncpa [#allocation4], 1 }
 0x41f   :  { %1572 = vsyncpa [#allocation4 + $0x1], 1 }

</bundles_post_ra>
